<compile_context>
chip_gen: v7x
topology: tpu7x:2x2x1
jax: 0.10.0
libtpu: 0.0.40
codegen_flags: <defaults>
</compile_context>

<pallas_src>
import functools

import jax
import jax.numpy as jnp
from jax import lax
from jax.experimental import pallas as pl
from jax.experimental.pallas import tpu as pltpu


def _round_up(x, m):
    return ((x + m - 1) // m) * m


# ------------------------------- Pallas kernel -------------------------------


def _yolo_head_kernel(x_ref, w_ref, b_ref, wo_ref, bo_ref, o_ref,
                      c0_ref, c1_ref, im2_ref, *,
                      W, P, KMAX, CMAX, L, S, CHUNK, MARGIN, anchors, eps):
    """Fused ConvBlock + 1x1 out-conv + YOLO head for one batch element.

    x_ref   : (1, Cin, S)  f32              NCHW input, spatial flattened (lanes = S)
    w_ref   : (L, CMAX, KMAX*KMAX*CMAX) bf16 hidden weights, [l, co, tap*CMAX + ci]
    b_ref   : (L, CMAX, 1) f32               hidden biases (BN folded)
    wo_ref  : (Cout, CMAX) bf16              1x1 out-conv weights (transposed, padded)
    bo_ref  : (Cout, 1)    f32
    o_ref   : (1, Cout, S) f32               output, NCHW-flat (lane-dense)
    c0/c1   : (CMAX, MARGIN+S+MARGIN) bf16   ping-pong activation canvases (VMEM)
    im2_ref : (KMAX*KMAX*CMAX, CHUNK) bf16   im2col staging scratch (VMEM)
    """
    Cin = x_ref.shape[1]
    cans = (c0_ref, c1_ref)
    CW = MARGIN + S + MARGIN
    cdt = c0_ref.dtype

    # Scratch persists across grid steps (and each TensorCore has its own copy under
    # "parallel" semantics), so re-establish each step only the invariants the conv
    # relies on: zero margins (vertical zero padding) and zero padded-input-channel
    # rows of canvas 0 (prevents NaN-bearing garbage from reaching the MXU even though
    # those rows hit zero-padded weight columns).  Interiors are overwritten below.
    zm = jnp.zeros((CMAX, MARGIN), cdt)
    c0_ref[:, 0:MARGIN] = zm
    c0_ref[:, MARGIN + S:CW] = zm
    c1_ref[:, 0:MARGIN] = zm
    c1_ref[:, MARGIN + S:CW] = zm
    if Cin < CMAX:
        c0_ref[Cin:CMAX, MARGIN:MARGIN + S] = jnp.zeros((CMAX - Cin, S), cdt)

    # Input is already lane-dense NCHW-flat; drop it into canvas 0's interior (bf16).
    c0_ref[0:Cin, MARGIN:MARGIN + S] = x_ref[0].astype(cdt)

    chunk_starts = [c * CHUNK for c in range(S // CHUNK)]

    # Horizontal-tap validity masks (a shift of dc columns must not wrap across image
    # rows).  Pre-broadcast to (CMAX, CHUNK) once; reused for every layer and tap.
    col = lax.broadcasted_iota(jnp.int32, (CMAX, CHUNK), 1)
    masks = {}
    for cs in chunk_starts:
        wcol = (col + cs) % W
        for dc in range(-P, P + 1):
            if dc != 0:
                masks[(cs, dc)] = jnp.logical_and(wcol + dc >= 0, wcol + dc < W)

    # Epilogue constants (whole-tile row select instead of sub-8-row concatenation).
    n = anchors
    c_out = o_ref.shape[1]
    c4, c2 = c_out - 4 * n, c_out - 2 * n
    row = lax.broadcasted_iota(jnp.int32, (c_out, CHUNK), 0)
    wo = wo_ref[...]                       # (Cout, CMAX) bf16
    bo = bo_ref[...]                       # (Cout, 1)    f32

    # Hidden conv(+BN fold)+ReLU layers, ping-ponging between the two VMEM canvases.
    # The final layer fuses the 1x1 out conv + YOLO head and writes o_ref directly.
    src = 0
    for l in range(L):
        last = l == L - 1
        dst = 1 - src
        for cs in chunk_starts:
            # im2col: stage all KMAX*KMAX taps into one (K, CHUNK) scratch slab with
            # aligned sublane stores, then run a single fat MXU contraction.
            for kh in range(KMAX):
                for kw in range(KMAX):
                    d = (kh - P) * W + (kw - P)              # flat shift of this tap
                    start = MARGIN + cs + d
                    sl = cans[src][:, start:start + CHUNK]   # (CMAX, CHUNK) bf16
                    dc = kw - P
                    if dc != 0:
                        sl = jnp.where(masks[(cs, dc)], sl, jnp.zeros_like(sl))
                    t = kh * KMAX + kw
                    im2_ref[t * CMAX:(t + 1) * CMAX, :] = sl
            # bf16 x bf16 -> f32 accumulate, M = CMAX, K = KMAX^2*CMAX, N = CHUNK.
            h = jnp.dot(w_ref[l], im2_ref[...],
                        preferred_element_type=jnp.float32) + b_ref[l]
            h = jnp.maximum(h, 0.0)                          # bias + ReLU in f32
            if not last:
                cans[dst][:, MARGIN + cs:MARGIN + cs + CHUNK] = h.astype(cdt)
            else:
                # Fused 1x1 out conv + YOLO head, written lane-dense straight to o_ref.
                y = jnp.dot(wo, h.astype(wo.dtype),
                            preferred_element_type=jnp.float32) + bo
                out = jnp.where(
                    row < c4, y,                              # objectness / class logits
                    jnp.where(row < c2, 2.0 * jnp.tanh(y),    # NormTanh(-1, 2) == 2*tanh
                              jnp.maximum(y, eps)))           # box sizes, clamped at eps
                o_ref[0, :, cs:cs + CHUNK] = out
        src = dst


# ------------------------------ pallas_call glue ------------------------------


def yolo_head_fused(x_flat, w_pack, b_pack, wo_pack, bo_pack, *,
                    W, KMAX, anchors, eps):
    B, Cin, S = x_flat.shape
    L, CMAX, KTOT = w_pack.shape
    c_out = wo_pack.shape[0]
    P = KMAX // 2

    # Spatial chunk == matmul N dim; >= 256 keeps the 256-wide MXU (v6e/v7x) full.
    if S % 256 == 0:
        CHUNK = 256
    elif S % 128 == 0:
        CHUNK = 128
    else:
        CHUNK = S
    # Canvas margin soaking up vertical tap shifts; multiple of 128 so every canvas
    # interior store / centered-tap load stays lane-aligned.
    MARGIN = _round_up(max(P * W + P, 1), 128)
    CW = MARGIN + S + MARGIN

    kernel = functools.partial(
        _yolo_head_kernel, W=W, P=P, KMAX=KMAX, CMAX=CMAX, L=L, S=S,
        CHUNK=CHUNK, MARGIN=MARGIN, anchors=anchors, eps=eps)

    # Explicit VMEM budget: bf16 canvases + im2col scratch + double-buffered I/O and
    # weight blocks, plus headroom for Mosaic-internal scratch.
    scratch_bytes = 2 * CMAX * CW * 2 + KTOT * CHUNK * 2
    block_bytes = (Cin * S * 4 + c_out * S * 4 + w_pack.nbytes + b_pack.nbytes
                   + wo_pack.nbytes + bo_pack.nbytes)
    vmem_limit = int(min(max(scratch_bytes + 2 * block_bytes + (8 << 20), 32 << 20),
                         100 << 20))
    # TODO(synk): for very large S/CMAX on v7x (64 MiB physical VMEM), split the spatial
    # axis into row bands with a P-row halo instead of raising the limit further.

    return pl.pallas_call(
        kernel,
        out_shape=jax.ShapeDtypeStruct((B, c_out, S), jnp.float32),
        grid_spec=pltpu.PrefetchScalarGridSpec(
            num_scalar_prefetch=0,
            grid=(B,),
            in_specs=[
                pl.BlockSpec((1, Cin, S), lambda b: (b, 0, 0)),
                pl.BlockSpec((L, CMAX, KTOT), lambda b: (0, 0, 0)),
                pl.BlockSpec((L, CMAX, 1), lambda b: (0, 0, 0)),
                pl.BlockSpec((c_out, CMAX), lambda b: (0, 0)),
                pl.BlockSpec((c_out, 1), lambda b: (0, 0)),
            ],
            out_specs=pl.BlockSpec((1, c_out, S), lambda b: (b, 0, 0)),
            scratch_shapes=[pltpu.VMEM((CMAX, CW), jnp.bfloat16),
                            pltpu.VMEM((CMAX, CW), jnp.bfloat16),
                            pltpu.VMEM((KTOT, CHUNK), jnp.bfloat16)],
        ),
        # Batch elements are independent; on dual-TC chips (v7x) grid steps shard
        # across TensorCores.  TODO(synk): at B == 1 add a spatial-band parallel axis.
        compiler_params=pltpu.CompilerParams(
            dimension_semantics=("parallel",),
            vmem_limit_bytes=vmem_limit),
    )(x_flat, w_pack, b_pack, wo_pack, bo_pack)


# ------------------------------- parameter setup ------------------------------


def _kaiming_uniform_hwio(key, kh, kw, cin, cout):
    # PyTorch kaiming_uniform_(mode='fan_in', nonlinearity='relu'):
    # bound = sqrt(2) * sqrt(3 / fan_in), fan_in = cin*kh*kw
    fan_in = cin * kh * kw
    bound = (2.0 ** 0.5) * (3.0 / fan_in) ** 0.5
    return jax.random.uniform(key, (kh, kw, cin, cout), jnp.float32, -bound, bound)


class YoloHeadPallas:
    """Pallas port of YoloHead: (conv+BN+ReLU)* -> 1x1 conv -> YOLO head, fully fused."""

    def __init__(self, key, in_features, anchors=1, clsnums=(),
                 hidden_features=(32, 32), hidden_kernels=(3, 3),
                 bn_eps=1e-5, eps=1e-5):
        assert len(hidden_features) == len(hidden_kernels)
        assert all(k % 2 == 1 for k in hidden_kernels), "only odd kernel sizes supported"
        self.anchors = int(anchors)
        self.eps = float(eps)
        self.out_ch = self.anchors * (5 + sum(clsnums))

        feats = [in_features] + list(hidden_features)
        L = len(hidden_kernels)
        KMAX = max(hidden_kernels)
        CMAX = _round_up(max(feats), 16)
        self.kmax = KMAX

        # Eval-mode BN fold with fresh running stats (gamma=1, beta=0, mean=0, var=1):
        # BN(conv(x)) = conv(x) / sqrt(1 + bn_eps)  ->  scale weights AND bias.
        bn_scale = 1.0 / (1.0 + bn_eps) ** 0.5

        self.layers_ref = []     # f32 folded (w_hwio, b) for the pure-JAX references
        w_pack, b_pack = [], []
        for i in range(1, len(feats)):
            key, wk = jax.random.split(key)
            k = hidden_kernels[i - 1]
            cin, cout = feats[i - 1], feats[i]
            w = _kaiming_uniform_hwio(wk, k, k, cin, cout) * bn_scale
            b = jnp.zeros((cout,), jnp.float32) * bn_scale   # Conv2d bias is zero-init
            self.layers_ref.append((w, b))
            # Uniformize: center-pad kernels to KMAX x KMAX, zero-pad channels to CMAX,
            # and arrange as [co, (kh*KMAX + kw)*CMAX + ci] so the kernel runs a single
            # fat K = KMAX^2*CMAX MXU contraction per spatial chunk.
            kp = (KMAX - k) // 2
            wp = jnp.pad(w, ((kp, kp), (kp, kp), (0, CMAX - cin), (0, CMAX - cout)))
            w_pack.append(jnp.transpose(wp, (3, 0, 1, 2)).reshape(CMAX, KMAX * KMAX * CMAX))
            b_pack.append(jnp.pad(b, (0, CMAX - cout)).reshape(CMAX, 1))
        self.w_pack = jnp.stack(w_pack).astype(jnp.bfloat16)   # (L, CMAX, K)
        self.b_pack = jnp.stack(b_pack)                        # (L, CMAX, 1) f32

        key, wk = jax.random.split(key)
        w_out = _kaiming_uniform_hwio(wk, 1, 1, feats[-1], self.out_ch)
        self.w_out_ref = w_out.reshape(feats[-1], self.out_ch)
        self.b_out_ref = jnp.zeros((self.out_ch,), jnp.float32)
        self.wo_pack = jnp.pad(self.w_out_ref.T,
                               ((0, 0), (0, CMAX - feats[-1]))).astype(jnp.bfloat16)
        self.bo_pack = self.b_out_ref.reshape(self.out_ch, 1)

    def __call__(self, x_nchw):
        B, C, H, W = x_nchw.shape
        # NCHW -> (B, C, H*W) is a metadata-only reshape; the fused kernel keeps this
        # orientation end-to-end, so no transposes or padded copies are materialized.
        x_flat = x_nchw.reshape(B, C, H * W).astype(jnp.float32)
        out_flat = yolo_head_fused(x_flat, self.w_pack, self.b_pack,
                                   self.wo_pack, self.bo_pack,
                                   W=W, KMAX=self.kmax,
                                   anchors=self.anchors, eps=self.eps)
        return out_flat.reshape(B, self.out_ch, H, W)


# --------------------------------- references ----------------------------------


def _reference_forward(model, x_nchw, emulate_bf16=False):
    """Pure-JAX reference.  With emulate_bf16=True it mirrors the kernel's arithmetic
    exactly (bf16 matmul operands, f32 accumulation / bias / ReLU / epilogue)."""
    cast = (lambda a: a.astype(jnp.bfloat16)) if emulate_bf16 else (lambda a: a)
    x = jnp.transpose(x_nchw, (0, 2, 3, 1)).astype(jnp.float32)
    B, H, W, _ = x.shape
    for w, b in model.layers_ref:
        kh, kw, _, cout = w.shape
        ph, pw = kh // 2, kw // 2
        xp = jnp.pad(cast(x), ((0, 0), (ph, ph), (pw, pw), (0, 0)))
        wb = cast(w)
        acc = jnp.zeros((B, H, W, cout), jnp.float32) + b
        for i in range(kh):
            for j in range(kw):
                acc = acc + jnp.einsum("bhwc,co->bhwo",
                                       xp[:, i:i + H, j:j + W, :], wb[i, j],
                                       preferred_element_type=jnp.float32)
        x = jnp.maximum(acc, 0.0)
    y = jnp.einsum("bhwc,co->bhwo", cast(x), cast(model.w_out_ref),
                   preferred_element_type=jnp.float32) + model.b_out_ref
    n = model.anchors
    c = y.shape[-1]
    out = jnp.concatenate(
        [y[..., :c - 4 * n],
         2.0 * jnp.tanh(y[..., c - 4 * n:c - 2 * n]),
         jnp.maximum(y[..., c - 2 * n:], model.eps)], axis=-1)
    return jnp.transpose(out, (0, 3, 1, 2))


# ------------------------------------ main -------------------------------------

if __name__ == "__main__":
    key = jax.random.PRNGKey(0)
    key, xkey, mkey = jax.random.split(key, 3)

    B, C, H, W = 2, 16, 16, 16            # small NCHW input
    x = jax.random.normal(xkey, (B, C, H, W), jnp.float32)

    model = YoloHeadPallas(
        mkey, in_features=C, anchors=1, clsnums=(),
        hidden_features=(32, 32), hidden_kernels=(3, 3))

    out = jax.block_until_ready(model(x))
    ref_bf16 = jax.block_until_ready(_reference_forward(model, x, emulate_bf16=True))
    ref_f32 = jax.block_until_ready(_reference_forward(model, x, emulate_bf16=False))

    assert out.shape == (B, 1 * (5 + 0), H, W), out.shape
    # Tight check vs a reference that mirrors the kernel's bf16-operand / f32-acc math.
    assert jnp.allclose(out, ref_bf16, rtol=1e-3, atol=1e-3), \
        float(jnp.max(jnp.abs(out - ref_bf16)))
    # Loose sanity check vs the pure-f32 reference (bounds bf16 quantization error).
    assert jnp.allclose(out, ref_f32, rtol=5e-2, atol=1e-1), \
        float(jnp.max(jnp.abs(out - ref_f32)))

    print("KERNEL_OK")
</pallas_src>

<mosaic_0001>
module attributes {stable_mosaic.version = 11 : i64} {
  func.func @_yolo_head_kernel(%arg0: i32, %arg1: memref<1x16x256xf32, #tpu.memory_space<vmem>>, %arg2: memref<2x32x288xbf16, #tpu.memory_space<vmem>>, %arg3: memref<2x32x1xf32, #tpu.memory_space<vmem>>, %arg4: memref<5x32xbf16, #tpu.memory_space<vmem>>, %arg5: memref<5x1xf32, #tpu.memory_space<vmem>>, %arg6: memref<1x5x256xf32, #tpu.memory_space<vmem>>, %arg7: memref<32x512xbf16, #tpu.memory_space<vmem>>, %arg8: memref<32x512xbf16, #tpu.memory_space<vmem>>, %arg9: memref<288x256xbf16, #tpu.memory_space<vmem>>) attributes {dimension_semantics = [#tpu.dimension_semantics<parallel>], iteration_bounds = array<i64: 2>, scalar_prefetch = 0 : i64, scratch_operands = 3 : i64, tpu.core_type = #tpu.core_type<tc>, window_params = [{transform_indices = @transform_0, window_bounds = array<i64: 1, 16, 256>}, {pipeline_mode = #tpu.pipeline_mode<synchronous>, transform_indices = @transform_1, window_bounds = array<i64: 2, 32, 288>}, {pipeline_mode = #tpu.pipeline_mode<synchronous>, transform_indices = @transform_2, window_bounds = array<i64: 2, 32, 1>}, {pipeline_mode = #tpu.pipeline_mode<synchronous>, transform_indices = @transform_3, window_bounds = array<i64: 5, 32>}, {pipeline_mode = #tpu.pipeline_mode<synchronous>, transform_indices = @transform_4, window_bounds = array<i64: 5, 1>}, {transform_indices = @transform_5, window_bounds = array<i64: 1, 5, 256>}]} {
    %cst = arith.constant 0.000000e+00 : bf16
    %0 = vector.broadcast %cst : bf16 to vector<32x128xbf16>
    %c0 = arith.constant 0 : index
    %c0_0 = arith.constant 0 : index
    %1 = vector.load %arg7[%c0, %c0_0] : memref<32x512xbf16, #tpu.memory_space<vmem>>, vector<32x128xbf16>
    tpu.vector_store %arg7[%c0, %c0_0], %0 {strides = array<i32>} : memref<32x512xbf16, #tpu.memory_space<vmem>>, vector<32x128xbf16>,
    %c0_1 = arith.constant 0 : index
    %c384 = arith.constant 384 : index
    %2 = vector.load %arg7[%c0_1, %c384] : memref<32x512xbf16, #tpu.memory_space<vmem>>, vector<32x128xbf16>
    tpu.vector_store %arg7[%c0_1, %c384], %0 {strides = array<i32>} : memref<32x512xbf16, #tpu.memory_space<vmem>>, vector<32x128xbf16>,
    %c0_2 = arith.constant 0 : index
    %c0_3 = arith.constant 0 : index
    %3 = vector.load %arg8[%c0_2, %c0_3] : memref<32x512xbf16, #tpu.memory_space<vmem>>, vector<32x128xbf16>
    tpu.vector_store %arg8[%c0_2, %c0_3], %0 {strides = array<i32>} : memref<32x512xbf16, #tpu.memory_space<vmem>>, vector<32x128xbf16>,
    %c0_4 = arith.constant 0 : index
    %c384_5 = arith.constant 384 : index
    %4 = vector.load %arg8[%c0_4, %c384_5] : memref<32x512xbf16, #tpu.memory_space<vmem>>, vector<32x128xbf16>
    tpu.vector_store %arg8[%c0_4, %c384_5], %0 {strides = array<i32>} : memref<32x512xbf16, #tpu.memory_space<vmem>>, vector<32x128xbf16>,
    %cst_6 = arith.constant 0.000000e+00 : bf16
    %5 = vector.broadcast %cst_6 : bf16 to vector<16x256xbf16>
    %c16 = arith.constant 16 : index
    %c128 = arith.constant 128 : index
    %6 = vector.load %arg7[%c16, %c128] : memref<32x512xbf16, #tpu.memory_space<vmem>>, vector<16x256xbf16>
    tpu.vector_store %arg7[%c16, %c128], %5 {strides = array<i32>} : memref<32x512xbf16, #tpu.memory_space<vmem>>, vector<16x256xbf16>,
    %c0_7 = arith.constant 0 : index
    %c0_8 = arith.constant 0 : index
    %c0_9 = arith.constant 0 : index
    %7 = vector.load %arg1[%c0_7, %c0_8, %c0_9] : memref<1x16x256xf32, #tpu.memory_space<vmem>>, vector<1x16x256xf32>
    %8 = vector.shape_cast %7 : vector<1x16x256xf32> to vector<16x256xf32>
    %9 = arith.truncf %8 : vector<16x256xf32> to vector<16x256xbf16>
    %c0_10 = arith.constant 0 : index
    %c128_11 = arith.constant 128 : index
    %10 = vector.load %arg7[%c0_10, %c128_11] : memref<32x512xbf16, #tpu.memory_space<vmem>>, vector<16x256xbf16>
    tpu.vector_store %arg7[%c0_10, %c128_11], %9 {strides = array<i32>} : memref<32x512xbf16, #tpu.memory_space<vmem>>, vector<16x256xbf16>,
    %11 = tpu.iota {dimensions = array<i32: 1>} : vector<32x256xi32>
    %c0_i32 = arith.constant 0 : i32
    %12 = vector.broadcast %c0_i32 : i32 to vector<32x256xi32>
    %13 = arith.addi %11, %12 : vector<32x256xi32>
    %c16_i32 = arith.constant 16 : i32
    %c0_i32_12 = arith.constant 0 : i32
    %14 = arith.cmpi eq, %c16_i32, %c0_i32_12 : i32
    %c1_i32 = arith.constant 1 : i32
    %15 = arith.select %14, %c1_i32, %c16_i32 : i32
    %16 = vector.broadcast %15 : i32 to vector<32x256xi32>
    %17 = arith.remsi %13, %16 : vector<32x256xi32>
    %c0_i32_13 = arith.constant 0 : i32
    %18 = vector.broadcast %c0_i32_13 : i32 to vector<32x256xi32>
    %19 = arith.cmpi ne, %17, %18 : vector<32x256xi32>
    %c0_i32_14 = arith.constant 0 : i32
    %20 = vector.broadcast %c0_i32_14 : i32 to vector<32x256xi32>
    %21 = arith.cmpi slt, %17, %20 : vector<32x256xi32>
    %c0_i32_15 = arith.constant 0 : i32
    %22 = arith.cmpi slt, %15, %c0_i32_15 : i32
    %23 = vector.broadcast %22 : i1 to vector<32x256xi1>
    %24 = vector.broadcast %23 : vector<32x256xi1> to vector<32x256xi1>
    %25 = arith.xori %21, %24 : vector<32x256xi1>
    %26 = arith.andi %25, %19 : vector<32x256xi1>
    %27 = vector.broadcast %15 : i32 to vector<32x256xi32>
    %28 = arith.addi %17, %27 : vector<32x256xi32>
    %29 = arith.select %26, %28, %17 : vector<32x256xi1>, vector<32x256xi32>
    %c-1_i32 = arith.constant -1 : i32
    %30 = vector.broadcast %c-1_i32 : i32 to vector<32x256xi32>
    %31 = arith.addi %29, %30 : vector<32x256xi32>
    %c0_i32_16 = arith.constant 0 : i32
    %32 = vector.broadcast %c0_i32_16 : i32 to vector<32x256xi32>
    %33 = arith.cmpi sge, %31, %32 : vector<32x256xi32>
    %c-1_i32_17 = arith.constant -1 : i32
    %34 = vector.broadcast %c-1_i32_17 : i32 to vector<32x256xi32>
    %35 = arith.addi %29, %34 : vector<32x256xi32>
    %c16_i32_18 = arith.constant 16 : i32
    %36 = vector.broadcast %c16_i32_18 : i32 to vector<32x256xi32>
    %37 = arith.cmpi slt, %35, %36 : vector<32x256xi32>
    %38 = arith.andi %33, %37 : vector<32x256xi1>
    %c1_i32_19 = arith.constant 1 : i32
    %39 = vector.broadcast %c1_i32_19 : i32 to vector<32x256xi32>
    %40 = arith.addi %29, %39 : vector<32x256xi32>
    %c0_i32_20 = arith.constant 0 : i32
    %41 = vector.broadcast %c0_i32_20 : i32 to vector<32x256xi32>
    %42 = arith.cmpi sge, %40, %41 : vector<32x256xi32>
    %c1_i32_21 = arith.constant 1 : i32
    %43 = vector.broadcast %c1_i32_21 : i32 to vector<32x256xi32>
    %44 = arith.addi %29, %43 : vector<32x256xi32>
    %c16_i32_22 = arith.constant 16 : i32
    %45 = vector.broadcast %c16_i32_22 : i32 to vector<32x256xi32>
    %46 = arith.cmpi slt, %44, %45 : vector<32x256xi32>
    %47 = arith.andi %42, %46 : vector<32x256xi1>
    %48 = tpu.iota {dimensions = array<i32: 0>} : vector<5x256xi32>
    %c0_23 = arith.constant 0 : index
    %c0_24 = arith.constant 0 : index
    %49 = vector.load %arg4[%c0_23, %c0_24] : memref<5x32xbf16, #tpu.memory_space<vmem>>, vector<5x32xbf16>
    %c0_25 = arith.constant 0 : index
    %c0_26 = arith.constant 0 : index
    %50 = vector.load %arg5[%c0_25, %c0_26] : memref<5x1xf32, #tpu.memory_space<vmem>>, vector<5x1xf32>
    %c0_27 = arith.constant 0 : index
    %c111 = arith.constant 111 : index
    %51 = vector.load %arg7[%c0_27, %c111] : memref<32x512xbf16, #tpu.memory_space<vmem>>, vector<32x256xbf16>
    %cst_28 = arith.constant 0.000000e+00 : bf16
    %52 = vector.broadcast %cst_28 : bf16 to vector<32x256xbf16>
    %53 = arith.select %38, %51, %52 : vector<32x256xi1>, vector<32x256xbf16>
    %c0_29 = arith.constant 0 : index
    %c0_30 = arith.constant 0 : index
    %54 = vector.load %arg9[%c0_29, %c0_30] : memref<288x256xbf16, #tpu.memory_space<vmem>>, vector<32x256xbf16>
    tpu.vector_store %arg9[%c0_29, %c0_30], %53 {strides = array<i32>} : memref<288x256xbf16, #tpu.memory_space<vmem>>, vector<32x256xbf16>,
    %c0_31 = arith.constant 0 : index
    %c112 = arith.constant 112 : index
    %55 = vector.load %arg7[%c0_31, %c112] : memref<32x512xbf16, #tpu.memory_space<vmem>>, vector<32x256xbf16>
    %c32 = arith.constant 32 : index
    %c0_32 = arith.constant 0 : index
    %56 = vector.load %arg9[%c32, %c0_32] : memref<288x256xbf16, #tpu.memory_space<vmem>>, vector<32x256xbf16>
    tpu.vector_store %arg9[%c32, %c0_32], %55 {strides = array<i32>} : memref<288x256xbf16, #tpu.memory_space<vmem>>, vector<32x256xbf16>,
    %c0_33 = arith.constant 0 : index
    %c113 = arith.constant 113 : index
    %57 = vector.load %arg7[%c0_33, %c113] : memref<32x512xbf16, #tpu.memory_space<vmem>>, vector<32x256xbf16>
    %cst_34 = arith.constant 0.000000e+00 : bf16
    %58 = vector.broadcast %cst_34 : bf16 to vector<32x256xbf16>
    %59 = arith.select %47, %57, %58 : vector<32x256xi1>, vector<32x256xbf16>
    %c64 = arith.constant 64 : index
    %c0_35 = arith.constant 0 : index
    %60 = vector.load %arg9[%c64, %c0_35] : memref<288x256xbf16, #tpu.memory_space<vmem>>, vector<32x256xbf16>
    tpu.vector_store %arg9[%c64, %c0_35], %59 {strides = array<i32>} : memref<288x256xbf16, #tpu.memory_space<vmem>>, vector<32x256xbf16>,
    %c0_36 = arith.constant 0 : index
    %c127 = arith.constant 127 : index
    %61 = vector.load %arg7[%c0_36, %c127] : memref<32x512xbf16, #tpu.memory_space<vmem>>, vector<32x256xbf16>
    %cst_37 = arith.constant 0.000000e+00 : bf16
    %62 = vector.broadcast %cst_37 : bf16 to vector<32x256xbf16>
    %63 = arith.select %38, %61, %62 : vector<32x256xi1>, vector<32x256xbf16>
    %c96 = arith.constant 96 : index
    %c0_38 = arith.constant 0 : index
    %64 = vector.load %arg9[%c96, %c0_38] : memref<288x256xbf16, #tpu.memory_space<vmem>>, vector<32x256xbf16>
    tpu.vector_store %arg9[%c96, %c0_38], %63 {strides = array<i32>} : memref<288x256xbf16, #tpu.memory_space<vmem>>, vector<32x256xbf16>,
    %c0_39 = arith.constant 0 : index
    %c128_40 = arith.constant 128 : index
    %65 = vector.load %arg7[%c0_39, %c128_40] : memref<32x512xbf16, #tpu.memory_space<vmem>>, vector<32x256xbf16>
    %c128_41 = arith.constant 128 : index
    %c0_42 = arith.constant 0 : index
    %66 = vector.load %arg9[%c128_41, %c0_42] : memref<288x256xbf16, #tpu.memory_space<vmem>>, vector<32x256xbf16>
    tpu.vector_store %arg9[%c128_41, %c0_42], %65 {strides = array<i32>} : memref<288x256xbf16, #tpu.memory_space<vmem>>, vector<32x256xbf16>,
    %c0_43 = arith.constant 0 : index
    %c129 = arith.constant 129 : index
    %67 = vector.load %arg7[%c0_43, %c129] : memref<32x512xbf16, #tpu.memory_space<vmem>>, vector<32x256xbf16>
    %cst_44 = arith.constant 0.000000e+00 : bf16
    %68 = vector.broadcast %cst_44 : bf16 to vector<32x256xbf16>
    %69 = arith.select %47, %67, %68 : vector<32x256xi1>, vector<32x256xbf16>
    %c160 = arith.constant 160 : index
    %c0_45 = arith.constant 0 : index
    %70 = vector.load %arg9[%c160, %c0_45] : memref<288x256xbf16, #tpu.memory_space<vmem>>, vector<32x256xbf16>
    tpu.vector_store %arg9[%c160, %c0_45], %69 {strides = array<i32>} : memref<288x256xbf16, #tpu.memory_space<vmem>>, vector<32x256xbf16>,
    %c0_46 = arith.constant 0 : index
    %c143 = arith.constant 143 : index
    %71 = vector.load %arg7[%c0_46, %c143] : memref<32x512xbf16, #tpu.memory_space<vmem>>, vector<32x256xbf16>
    %cst_47 = arith.constant 0.000000e+00 : bf16
    %72 = vector.broadcast %cst_47 : bf16 to vector<32x256xbf16>
    %73 = arith.select %38, %71, %72 : vector<32x256xi1>, vector<32x256xbf16>
    %c192 = arith.constant 192 : index
    %c0_48 = arith.constant 0 : index
    %74 = vector.load %arg9[%c192, %c0_48] : memref<288x256xbf16, #tpu.memory_space<vmem>>, vector<32x256xbf16>
    tpu.vector_store %arg9[%c192, %c0_48], %73 {strides = array<i32>} : memref<288x256xbf16, #tpu.memory_space<vmem>>, vector<32x256xbf16>,
    %c0_49 = arith.constant 0 : index
    %c144 = arith.constant 144 : index
    %75 = vector.load %arg7[%c0_49, %c144] : memref<32x512xbf16, #tpu.memory_space<vmem>>, vector<32x256xbf16>
    %c224 = arith.constant 224 : index
    %c0_50 = arith.constant 0 : index
    %76 = vector.load %arg9[%c224, %c0_50] : memref<288x256xbf16, #tpu.memory_space<vmem>>, vector<32x256xbf16>
    tpu.vector_store %arg9[%c224, %c0_50], %75 {strides = array<i32>} : memref<288x256xbf16, #tpu.memory_space<vmem>>, vector<32x256xbf16>,
    %c0_51 = arith.constant 0 : index
    %c145 = arith.constant 145 : index
    %77 = vector.load %arg7[%c0_51, %c145] : memref<32x512xbf16, #tpu.memory_space<vmem>>, vector<32x256xbf16>
    %cst_52 = arith.constant 0.000000e+00 : bf16
    %78 = vector.broadcast %cst_52 : bf16 to vector<32x256xbf16>
    %79 = arith.select %47, %77, %78 : vector<32x256xi1>, vector<32x256xbf16>
    %c256 = arith.constant 256 : index
    %c0_53 = arith.constant 0 : index
    %80 = vector.load %arg9[%c256, %c0_53] : memref<288x256xbf16, #tpu.memory_space<vmem>>, vector<32x256xbf16>
    tpu.vector_store %arg9[%c256, %c0_53], %79 {strides = array<i32>} : memref<288x256xbf16, #tpu.memory_space<vmem>>, vector<32x256xbf16>,
    %c0_54 = arith.constant 0 : index
    %c0_55 = arith.constant 0 : index
    %c0_56 = arith.constant 0 : index
    %81 = vector.load %arg2[%c0_54, %c0_55, %c0_56] : memref<2x32x288xbf16, #tpu.memory_space<vmem>>, vector<1x32x288xbf16>
    %82 = vector.shape_cast %81 : vector<1x32x288xbf16> to vector<32x288xbf16>
    %c0_57 = arith.constant 0 : index
    %c0_58 = arith.constant 0 : index
    %83 = vector.load %arg9[%c0_57, %c0_58] : memref<288x256xbf16, #tpu.memory_space<vmem>>, vector<288x256xbf16>
    %cst_59 = arith.constant dense<0.000000e+00> : vector<32x256xf32>
    %84 = tpu.matmul %82, %83, %cst_59 {dimension_numbers = #tpu.dot_dimension_numbers<[1], [0], [0], [1], [0, 0, 1, 1], [], []>} : vector<32x288xbf16>, vector<288x256xbf16>, vector<32x256xf32> -> vector<32x256xf32>
    %c0_60 = arith.constant 0 : index
    %c0_61 = arith.constant 0 : index
    %c0_62 = arith.constant 0 : index
    %85 = vector.load %arg3[%c0_60, %c0_61, %c0_62] : memref<2x32x1xf32, #tpu.memory_space<vmem>>, vector<1x32x1xf32>
    %86 = vector.shape_cast %85 : vector<1x32x1xf32> to vector<32x1xf32>
    %87 = vector.broadcast %86 : vector<32x1xf32> to vector<32x256xf32>
    %88 = arith.addf %84, %87 : vector<32x256xf32>
    %cst_63 = arith.constant 0.000000e+00 : f32
    %89 = vector.broadcast %cst_63 : f32 to vector<32x256xf32>
    %90 = arith.maximumf %88, %89 : vector<32x256xf32>
    %91 = arith.truncf %90 : vector<32x256xf32> to vector<32x256xbf16>
    %c0_64 = arith.constant 0 : index
    %c128_65 = arith.constant 128 : index
    %92 = vector.load %arg8[%c0_64, %c128_65] : memref<32x512xbf16, #tpu.memory_space<vmem>>, vector<32x256xbf16>
    tpu.vector_store %arg8[%c0_64, %c128_65], %91 {strides = array<i32>} : memref<32x512xbf16, #tpu.memory_space<vmem>>, vector<32x256xbf16>,
    %c0_66 = arith.constant 0 : index
    %c111_67 = arith.constant 111 : index
    %93 = vector.load %arg8[%c0_66, %c111_67] : memref<32x512xbf16, #tpu.memory_space<vmem>>, vector<32x256xbf16>
    %cst_68 = arith.constant 0.000000e+00 : bf16
    %94 = vector.broadcast %cst_68 : bf16 to vector<32x256xbf16>
    %95 = arith.select %38, %93, %94 : vector<32x256xi1>, vector<32x256xbf16>
    %c0_69 = arith.constant 0 : index
    %c0_70 = arith.constant 0 : index
    %96 = vector.load %arg9[%c0_69, %c0_70] : memref<288x256xbf16, #tpu.memory_space<vmem>>, vector<32x256xbf16>
    tpu.vector_store %arg9[%c0_69, %c0_70], %95 {strides = array<i32>} : memref<288x256xbf16, #tpu.memory_space<vmem>>, vector<32x256xbf16>,
    %c0_71 = arith.constant 0 : index
    %c112_72 = arith.constant 112 : index
    %97 = vector.load %arg8[%c0_71, %c112_72] : memref<32x512xbf16, #tpu.memory_space<vmem>>, vector<32x256xbf16>
    %c32_73 = arith.constant 32 : index
    %c0_74 = arith.constant 0 : index
    %98 = vector.load %arg9[%c32_73, %c0_74] : memref<288x256xbf16, #tpu.memory_space<vmem>>, vector<32x256xbf16>
    tpu.vector_store %arg9[%c32_73, %c0_74], %97 {strides = array<i32>} : memref<288x256xbf16, #tpu.memory_space<vmem>>, vector<32x256xbf16>,
    %c0_75 = arith.constant 0 : index
    %c113_76 = arith.constant 113 : index
    %99 = vector.load %arg8[%c0_75, %c113_76] : memref<32x512xbf16, #tpu.memory_space<vmem>>, vector<32x256xbf16>
    %cst_77 = arith.constant 0.000000e+00 : bf16
    %100 = vector.broadcast %cst_77 : bf16 to vector<32x256xbf16>
    %101 = arith.select %47, %99, %100 : vector<32x256xi1>, vector<32x256xbf16>
    %c64_78 = arith.constant 64 : index
    %c0_79 = arith.constant 0 : index
    %102 = vector.load %arg9[%c64_78, %c0_79] : memref<288x256xbf16, #tpu.memory_space<vmem>>, vector<32x256xbf16>
    tpu.vector_store %arg9[%c64_78, %c0_79], %101 {strides = array<i32>} : memref<288x256xbf16, #tpu.memory_space<vmem>>, vector<32x256xbf16>,
    %c0_80 = arith.constant 0 : index
    %c127_81 = arith.constant 127 : index
    %103 = vector.load %arg8[%c0_80, %c127_81] : memref<32x512xbf16, #tpu.memory_space<vmem>>, vector<32x256xbf16>
    %cst_82 = arith.constant 0.000000e+00 : bf16
    %104 = vector.broadcast %cst_82 : bf16 to vector<32x256xbf16>
    %105 = arith.select %38, %103, %104 : vector<32x256xi1>, vector<32x256xbf16>
    %c96_83 = arith.constant 96 : index
    %c0_84 = arith.constant 0 : index
    %106 = vector.load %arg9[%c96_83, %c0_84] : memref<288x256xbf16, #tpu.memory_space<vmem>>, vector<32x256xbf16>
    tpu.vector_store %arg9[%c96_83, %c0_84], %105 {strides = array<i32>} : memref<288x256xbf16, #tpu.memory_space<vmem>>, vector<32x256xbf16>,
    %c0_85 = arith.constant 0 : index
    %c128_86 = arith.constant 128 : index
    %107 = vector.load %arg8[%c0_85, %c128_86] : memref<32x512xbf16, #tpu.memory_space<vmem>>, vector<32x256xbf16>
    %c128_87 = arith.constant 128 : index
    %c0_88 = arith.constant 0 : index
    %108 = vector.load %arg9[%c128_87, %c0_88] : memref<288x256xbf16, #tpu.memory_space<vmem>>, vector<32x256xbf16>
    tpu.vector_store %arg9[%c128_87, %c0_88], %107 {strides = array<i32>} : memref<288x256xbf16, #tpu.memory_space<vmem>>, vector<32x256xbf16>,
    %c0_89 = arith.constant 0 : index
    %c129_90 = arith.constant 129 : index
    %109 = vector.load %arg8[%c0_89, %c129_90] : memref<32x512xbf16, #tpu.memory_space<vmem>>, vector<32x256xbf16>
    %cst_91 = arith.constant 0.000000e+00 : bf16
    %110 = vector.broadcast %cst_91 : bf16 to vector<32x256xbf16>
    %111 = arith.select %47, %109, %110 : vector<32x256xi1>, vector<32x256xbf16>
    %c160_92 = arith.constant 160 : index
    %c0_93 = arith.constant 0 : index
    %112 = vector.load %arg9[%c160_92, %c0_93] : memref<288x256xbf16, #tpu.memory_space<vmem>>, vector<32x256xbf16>
    tpu.vector_store %arg9[%c160_92, %c0_93], %111 {strides = array<i32>} : memref<288x256xbf16, #tpu.memory_space<vmem>>, vector<32x256xbf16>,
    %c0_94 = arith.constant 0 : index
    %c143_95 = arith.constant 143 : index
    %113 = vector.load %arg8[%c0_94, %c143_95] : memref<32x512xbf16, #tpu.memory_space<vmem>>, vector<32x256xbf16>
    %cst_96 = arith.constant 0.000000e+00 : bf16
    %114 = vector.broadcast %cst_96 : bf16 to vector<32x256xbf16>
    %115 = arith.select %38, %113, %114 : vector<32x256xi1>, vector<32x256xbf16>
    %c192_97 = arith.constant 192 : index
    %c0_98 = arith.constant 0 : index
    %116 = vector.load %arg9[%c192_97, %c0_98] : memref<288x256xbf16, #tpu.memory_space<vmem>>, vector<32x256xbf16>
    tpu.vector_store %arg9[%c192_97, %c0_98], %115 {strides = array<i32>} : memref<288x256xbf16, #tpu.memory_space<vmem>>, vector<32x256xbf16>,
    %c0_99 = arith.constant 0 : index
    %c144_100 = arith.constant 144 : index
    %117 = vector.load %arg8[%c0_99, %c144_100] : memref<32x512xbf16, #tpu.memory_space<vmem>>, vector<32x256xbf16>
    %c224_101 = arith.constant 224 : index
    %c0_102 = arith.constant 0 : index
    %118 = vector.load %arg9[%c224_101, %c0_102] : memref<288x256xbf16, #tpu.memory_space<vmem>>, vector<32x256xbf16>
    tpu.vector_store %arg9[%c224_101, %c0_102], %117 {strides = array<i32>} : memref<288x256xbf16, #tpu.memory_space<vmem>>, vector<32x256xbf16>,
    %c0_103 = arith.constant 0 : index
    %c145_104 = arith.constant 145 : index
    %119 = vector.load %arg8[%c0_103, %c145_104] : memref<32x512xbf16, #tpu.memory_space<vmem>>, vector<32x256xbf16>
    %cst_105 = arith.constant 0.000000e+00 : bf16
    %120 = vector.broadcast %cst_105 : bf16 to vector<32x256xbf16>
    %121 = arith.select %47, %119, %120 : vector<32x256xi1>, vector<32x256xbf16>
    %c256_106 = arith.constant 256 : index
    %c0_107 = arith.constant 0 : index
    %122 = vector.load %arg9[%c256_106, %c0_107] : memref<288x256xbf16, #tpu.memory_space<vmem>>, vector<32x256xbf16>
    tpu.vector_store %arg9[%c256_106, %c0_107], %121 {strides = array<i32>} : memref<288x256xbf16, #tpu.memory_space<vmem>>, vector<32x256xbf16>,
    %c1 = arith.constant 1 : index
    %c0_108 = arith.constant 0 : index
    %c0_109 = arith.constant 0 : index
    %123 = vector.load %arg2[%c1, %c0_108, %c0_109] : memref<2x32x288xbf16, #tpu.memory_space<vmem>>, vector<1x32x288xbf16>
    %124 = vector.shape_cast %123 : vector<1x32x288xbf16> to vector<32x288xbf16>
    %c0_110 = arith.constant 0 : index
    %c0_111 = arith.constant 0 : index
    %125 = vector.load %arg9[%c0_110, %c0_111] : memref<288x256xbf16, #tpu.memory_space<vmem>>, vector<288x256xbf16>
    %cst_112 = arith.constant dense<0.000000e+00> : vector<32x256xf32>
    %126 = tpu.matmul %124, %125, %cst_112 {dimension_numbers = #tpu.dot_dimension_numbers<[1], [0], [0], [1], [0, 0, 1, 1], [], []>} : vector<32x288xbf16>, vector<288x256xbf16>, vector<32x256xf32> -> vector<32x256xf32>
    %c1_113 = arith.constant 1 : index
    %c0_114 = arith.constant 0 : index
    %c0_115 = arith.constant 0 : index
    %127 = vector.load %arg3[%c1_113, %c0_114, %c0_115] : memref<2x32x1xf32, #tpu.memory_space<vmem>>, vector<1x32x1xf32>
    %128 = vector.shape_cast %127 : vector<1x32x1xf32> to vector<32x1xf32>
    %129 = vector.broadcast %128 : vector<32x1xf32> to vector<32x256xf32>
    %130 = arith.addf %126, %129 : vector<32x256xf32>
    %cst_116 = arith.constant 0.000000e+00 : f32
    %131 = vector.broadcast %cst_116 : f32 to vector<32x256xf32>
    %132 = arith.maximumf %130, %131 : vector<32x256xf32>
    %133 = arith.truncf %132 : vector<32x256xf32> to vector<32x256xbf16>
    %cst_117 = arith.constant dense<0.000000e+00> : vector<5x256xf32>
    %134 = tpu.matmul %49, %133, %cst_117 {dimension_numbers = #tpu.dot_dimension_numbers<[1], [0], [0], [1], [0, 0, 1, 1], [], []>} : vector<5x32xbf16>, vector<32x256xbf16>, vector<5x256xf32> -> vector<5x256xf32>
    %135 = vector.broadcast %50 : vector<5x1xf32> to vector<5x256xf32>
    %136 = arith.addf %134, %135 : vector<5x256xf32>
    %c1_i32_118 = arith.constant 1 : i32
    %137 = vector.broadcast %c1_i32_118 : i32 to vector<5x256xi32>
    %138 = arith.cmpi slt, %48, %137 : vector<5x256xi32>
    %c3_i32 = arith.constant 3 : i32
    %139 = vector.broadcast %c3_i32 : i32 to vector<5x256xi32>
    %140 = arith.cmpi slt, %48, %139 : vector<5x256xi32>
    %141 = math.tanh %136 : vector<5x256xf32>
    %cst_119 = arith.constant 2.000000e+00 : f32
    %142 = vector.broadcast %cst_119 : f32 to vector<5x256xf32>
    %143 = arith.mulf %142, %141 : vector<5x256xf32>
    %cst_120 = arith.constant 9.99999974E-6 : f32
    %144 = vector.broadcast %cst_120 : f32 to vector<5x256xf32>
    %145 = arith.maximumf %136, %144 : vector<5x256xf32>
    %146 = arith.select %140, %143, %145 : vector<5x256xi1>, vector<5x256xf32>
    %147 = arith.select %138, %136, %146 : vector<5x256xi1>, vector<5x256xf32>
    %c0_121 = arith.constant 0 : index
    %c0_122 = arith.constant 0 : index
    %c0_123 = arith.constant 0 : index
    %148 = vector.load %arg6[%c0_121, %c0_122, %c0_123] : memref<1x5x256xf32, #tpu.memory_space<vmem>>, vector<1x5x256xf32>
    %149 = vector.shape_cast %148 : vector<1x5x256xf32> to vector<5x256xf32>
    %150 = vector.shape_cast %147 : vector<5x256xf32> to vector<1x5x256xf32>
    tpu.vector_store %arg6[%c0_121, %c0_122, %c0_123], %150 {strides = array<i32>} : memref<1x5x256xf32, #tpu.memory_space<vmem>>, vector<1x5x256xf32>,
    return
  }
  func.func @transform_0(%arg0: i32) -> (i32, i32, i32) {
    %c0_i32 = arith.constant 0 : i32
    %c0_i32_0 = arith.constant 0 : i32
    %c0_i32_1 = arith.constant 0 : i32
    return %arg0, %c0_i32, %c0_i32_0 : i32, i32, i32
  }
  func.func @transform_1(%arg0: i32) -> (i32, i32, i32) {
    %c0_i32 = arith.constant 0 : i32
    %c0_i32_0 = arith.constant 0 : i32
    %c0_i32_1 = arith.constant 0 : i32
    %c0_i32_2 = arith.constant 0 : i32
    return %c0_i32, %c0_i32_0, %c0_i32_1 : i32, i32, i32
  }
  func.func @transform_2(%arg0: i32) -> (i32, i32, i32) {
    %c0_i32 = arith.constant 0 : i32
    %c0_i32_0 = arith.constant 0 : i32
    %c0_i32_1 = arith.constant 0 : i32
    %c0_i32_2 = arith.constant 0 : i32
    return %c0_i32, %c0_i32_0, %c0_i32_1 : i32, i32, i32
  }
  func.func @transform_3(%arg0: i32) -> (i32, i32) {
    %c0_i32 = arith.constant 0 : i32
    %c0_i32_0 = arith.constant 0 : i32
    %c0_i32_1 = arith.constant 0 : i32
    return %c0_i32, %c0_i32_0 : i32, i32
  }
  func.func @transform_4(%arg0: i32) -> (i32, i32) {
    %c0_i32 = arith.constant 0 : i32
    %c0_i32_0 = arith.constant 0 : i32
    %c0_i32_1 = arith.constant 0 : i32
    return %c0_i32, %c0_i32_0 : i32, i32
  }
  func.func @transform_5(%arg0: i32) -> (i32, i32, i32) {
    %c0_i32 = arith.constant 0 : i32
    %c0_i32_0 = arith.constant 0 : i32
    %c0_i32_1 = arith.constant 0 : i32
    return %arg0, %c0_i32, %c0_i32_0 : i32, i32, i32
  }
}

</mosaic_0001>

<bundles_post_ra>
// kernel: tpu_custom_call.1
= control target key start
LH: loop header
LB: loop body
LE: loop exit
PB: predicated region body
PF: predicated region fallthrough
CT: control target
= control target key end

     0   :  { %10 = vsyncpa [#allocation6], 0  ;;  %s1941_s18 = smov 0   ;;  %s2415_s0 = inlined_call_operand.vmem [shape: f32[2,16,256], index: 0, kind: input, shape index: {}]   ;;  %s2416_s1 = inlined_call_operand.hbm [shape: bf16[2,32,288], index: 1, kind: input, shape index: {}]   ;;  %s2417_s2 = inlined_call_operand.vmem [shape: f32[2,32,1], index: 2, kind: input, shape index: {}]   ;;  %s2418_s3 = inlined_call_operand.vmem [shape: bf16[5,32], index: 3, kind: input, shape index: {}]   ;;  %s2419_s4 = inlined_call_operand.vmem [shape: f32[5,1], index: 4, kind: input, shape index: {}]   ;;  %s2420_s5 = inlined_call_operand.vmem [shape: f32[2,5,256], index: 5, kind: output, shape index: {}]  }
   0x1 LB: > { %s1947_s19 = sadd.s32 4294967295, %s1897_s18   ;;  %p1631_p0 = scmp.ge.s32.totalorder %s1897_s18, 1  ;;  %s1897_s18 = sphi %s1941_s18, %s16_s18  }
   0x2   : > { %p157_p1 = scmp.lt.s32.totalorder %s1897_s18, 3  ;;  %s1899_s20 = smov [#allocation5]  }
   0x3   : > { %s169_s21 = sshll.u32 %s1899_s20, 4  ;;  %p2421_p3 = scmp.eq.s32.totalorder %s1947_s19, 0  ;;  %s170_s21 = int_to_ptr.vmem [resolvable:$true] %s169_s21 }
   0x4   : > { %p1951_p2 = pnand %p1631_p0, %p157_p1  ;;  %s1859_s26 = scalar_lea.hbm %s2416_s1, 1536 }
   0x5   : > { %p1860_p6 = scmp.ne.s32.totalorder %s2416_s1, %s1859_s26  ;;  %p1866_p10 = scmp.lt.u32.totalorder %s1859_s26, %s2416_s1 }
   0x6   : > { %s2428_s22 = scalar_select %p1951_p2, 1, 0 }
   0x7   : > { %p1701_p4 = pneg %p1951_p2 }
   0x9   : > { %p1960_p5 = pnand %p2421_p3, %p1701_p4 }
   0xb   : > { %p1861_p7 = pneg %p1960_p5 }
   0xd   : > { %p1862_p8 = pnand %p1861_p7, %p1860_p6 }
   0xf   : > { %p1863_p9 = pneg %p1862_p8 }
  0x11   : > { %p1868_p11 = pnand %p1866_p10, %p1863_p9 }
  0x13   : > { %1871 = shalt.err (!%p1868_p11)
}
  0x14   : > { %s1872_s6 = scalar_lea.vmem %s170_s21, 1536  ;;  %p1880_p1 = scmp.lt.s32.totalorder %s170_s21, %s170_s21 }
  0x15   : > { %p1873_p12 = scmp.ne.s32.totalorder %s170_s21, %s1872_s6  ;;  %p1881_p4 = scmp.lt.s32.totalorder %s1872_s6, %s1872_s6 }
  0x17   : > { %p1875_p13 = pnand %p1873_p12, %p1861_p7  ;;  %p1882_p3 = por %p1881_p4, %p1880_p1 }
  0x19   : > { %p1876_p0 = pneg %p1875_p13 }
  0x1b   : > { %p1883_p2 = pnand %p1882_p3, %p1876_p0 }
  0x1d   : > { %1886 = shalt.err (!%p1883_p2)
}
  0x1e   : > { %s1900_s7 = smov 192   ;;  %s1901_s8 = smov 12  }
  0x1f   : > { %1704 = dma.hbm_to_vmem [thread:$0]  (!%p1960_p5), %s2416_s1, 1536, %s170_s21, [#allocation6], %s1900_s7, %s1900_s7, %s1901_s8  }
  0x20   : > { %p2430_p6 = scmp.ne.s32.totalorder %s2428_s22, 0 }
  0x21   : > { %v261_v0 = vlaneseq (!%p2430_p6)  ;;  %p2431_p7 = scmp.eq.s32.totalorder (!%p2430_p6), %s1947_s19, 0 }
  0x22   : > { %202 = sbr.rel (%p2430_p6) target bundleno = 1321 (0x529), region = 40 }
  0x29   : > { %1892 = dma.done.wait (%p2431_p7), [#allocation6], 1536   ;;  %p2432_p8 = pmov %p2431_p7 }
  0x2a   : > { %v1902_v1 = vmov 0   ;;  %v262_v2 = vand.u32 127, %v261_v0  ;;  %v1988_v5 = vshrl.u32 %v261_v0, 7  ;;  %s1903_s11 = smov 111   ;;  %s1904_s12 = smov 113   ;;  %vm328_vm6 = vcmask 908288  }
  0x2b   : > { %1894 = vsyncadd (%p2432_p8), [#allocation6], 4294965760  ;;  %1807 = vset.pattern.permute.xlu0 %v1902_v1  ;;  %1808 = vset.pattern.permute.xlu1 %v1902_v1  ;;  %s1905_s13 = smov 127   ;;  %s1906_s14 = smov 1   ;;  %vm427_vm9 = vcmask 924672   ;;  %vm479_vm12 = vcmask 1039360  }
  0x2c   : > { %v263_v3 = vadd.s32 128, %v262_v2  ;;  %v268_v4 = vand.u32 15, %v262_v2  ;;  %v318_v11 = vsub.s32 0, %v1988_v5  ;;  %v322_v12 = vsub.s32 4, %v1988_v5  ;;  %s1907_s15 = smov 15   ;;  %s1908_s16 = smov 17  }
  0x2d   : > { %p230_p2 = scmp.lt.s32.totalorder %s1947_s19, 1  ;;  %s1909_s23 = smov 16   ;;  %vm2426_vm15 = vcmask 7168   ;;  %v1841_v50 = vld [vmem:[#allocation5 + $0x4] ss:$12 sps:$4 sm:$0xff]  }
  0x2e   : > { %v275_v6 = vand.u32 15, %v263_v3  ;;  %v288_v7 = vadd.s32 4294967295, %v268_v4  ;;  %v296_v8 = vadd.s32 1, %v268_v4  ;;  %s1910_s24 = smov 112   ;;  %853 = vmatprep.mubr.bf16.mxu0 %v1841_v50 }
  0x2f   : > { %s2448_s19 = smov (!%p230_p2, %s1947_s19), 1 }
  0x30   : > { %v289_v9 = vadd.s32 4294967295, %v275_v6  ;;  %vm290_vm0 = vcmp.ge.s32.totalorder %v288_v7, 0  ;;  %v297_v10 = vadd.s32 1, %v275_v6  ;;  %vm300_vm1 = vcmp.lt.s32.totalorder %v296_v8, 16  ;;  %s1663_s17 = sshll.u32 %s2448_s19, 5 }
  0x31   : > { %s234_s22 = scalar_lea.vmem %s2415_s0, %s1663_s17 }
  0x32   : > { %vm291_vm2 = vcmp.ge.s32.totalorder %v289_v9, 0  ;;  %vm301_vm3 = vcmp.lt.s32.totalorder %v297_v10, 16  ;;  %v254_v19 = vld [vmem:[%s234_s22 + $0x8] sm:$0xff]  ;;  %v256_v20 = vld [vmem:[%s234_s22 + $0x18] sm:$0xff]  ;;  %v253_v22 = vld [vmem:[%s234_s22] sm:$0xff] }
  0x33   : > { %vm314_vm4 = vmpackc.low %vm291_vm2, %vm290_vm0  ;;  %v255_v23 = vld [vmem:[%s234_s22 + $0x10] sm:$0xff]  ;;  %v2016_v24 = vpack.c.bf16 %v256_v20, %v254_v19  ;;  %s1664_s22 = sshll.u32 %s2448_s19, 4 }
  0x34   : > { %v315_v13 = vsel %vm314_vm4, 65537, %v1902_v1  ;;  %vm413_vm5 = vmpackc.low %vm301_vm3, %vm300_vm1  ;;  %v2018_v25 = vpack.c.bf16 %v255_v23, %v253_v22  ;;  %vm456_vm1 = vcmask 121856   ;;  %s239_s25 = scalar_lea.vmem %s2420_s5, %s1664_s22 }
  0x35   : > { %v319_v14 = vrot.slane %v315_v13, %v318_v11  ;;  %v414_v15 = vsel %vm413_vm5, 65537, %v1902_v1  ;;  %v323_v17 = vrot.slane %v315_v13, %v322_v12  ;;  %vm357_vm5 = vcmask 138240  }
  0x36   : > { %v418_v16 = vrot.slane %v414_v15, %v318_v11  ;;  %v422_v18 = vrot.slane %v414_v15, %v322_v12 }
  0x37   : > { %324 = vrot.lane.b32.xlu0 %v319_v14, %s1903_s11 }
  0x38   : > { %423 = vrot.lane.b32.xlu1 %v418_v16, %s1904_s12 }
  0x3b   : > { %326 = vrot.lane.b32.xlu0 %v323_v17, %s1903_s11 }
  0x3c   : > { %425 = vrot.lane.b32.xlu1 %v422_v18, %s1904_s12 }
  0x3f   : > { %475 = vrot.lane.b32.xlu0 %v319_v14, %s1905_s13 }
  0x40   : > { %477 = vrot.lane.b32.xlu1 %v323_v17, %s1905_s13 }
  0x43   : > { %535 = vrot.lane.b32.xlu0 %v418_v16, %s1906_s14 }
  0x44   : > { %537 = vrot.lane.b32.xlu1 %v422_v18, %s1906_s14 }
  0x47   : > { %585 = vrot.lane.b32.xlu0 %v319_v14, %s1907_s15 }
  0x48   : > { %587 = vrot.lane.b32.xlu1 %v323_v17, %s1907_s15 }
  0x4b   : > { %1728 = vrot.lane.b32.xlu0 %v1902_v1, %s1908_s16 }
  0x4c   : > { %1733 = vrot.lane.b32.xlu1 %v1902_v1, %s1908_s16 }
  0xa9   : > { %v325_v21 = vpop.permute.xlu0 %324 }
  0xaa   : > { %v424_v29 = vpop.permute.xlu1 %423 }
  0xad   : > { %v2020_v26 = vpop.permute.xlu0 %326 }
  0xae   : > { %v2024_v27 = vsel %vm328_vm6, %v325_v21, %v2020_v26  ;;  %vm332_vm7 = vcmp.ne.s16.totalorder %v2020_v26, 0  ;;  %v2040_v31 = vpop.permute.xlu1 %425 }
  0xaf   : > { %vm331_vm8 = vcmp.ne.s16.totalorder %v2024_v27, 0  ;;  %v335_v28 = vsel %vm332_vm7, %v2016_v24, 0  ;;  %v2045_v32 = vsel %vm427_vm9, %v424_v29, %v2040_v31  ;;  %vm431_vm10 = vcmp.ne.s16.totalorder %v2040_v31, 0 }
  0xb0   : > { %349 = vrot.lane.b32.xlu1 %v335_v28, %s1908_s16  ;;  %v334_v30 = vsel %vm331_vm8, %v2018_v25, 0  ;;  %vm430_vm11 = vcmp.ne.s16.totalorder %v2045_v32, 0  ;;  %v434_v33 = vsel %vm431_vm10, %v2016_v24, 0 }
  0xb1   : > { %347 = vrot.lane.b32.xlu0 %v334_v30, %s1908_s16  ;;  %v476_v35 = vpop.permute.xlu0 %475  ;;  %v433_v36 = vsel %vm430_vm11, %v2018_v25, 0 }
  0xb2   : > { %v2057_v34 = vpop.permute.xlu1 %477 }
  0xb3   : > { %v2065_v37 = vsel %vm479_vm12, %v476_v35, %v2057_v34  ;;  %vm483_vm13 = vcmp.ne.s16.totalorder %v2057_v34, 0 }
  0xb4   : > { %386 = vrot.lane.b32.xlu1 %v2016_v24, %s1909_s23  ;;  %vm482_vm14 = vcmp.ne.s16.totalorder %v2065_v37, 0  ;;  %v486_v38 = vsel %vm483_vm13, %v2016_v24, 0 }
  0xb5   : > { %384 = vrot.lane.b32.xlu0 %v2018_v25, %s1909_s23  ;;  %v2077_v40 = vpop.permute.xlu0 %535  ;;  %v485_v41 = vsel %vm482_vm14, %v2018_v25, 0 }
  0xb6   : > { %v538_v39 = vpop.permute.xlu1 %537  ;;  %vm2424_vm2 = vcmp.ne.s16.totalorder %v2077_v40, 0 }
  0xb7   : > { %v2085_v42 = vsel %vm2426_vm15, %v2077_v40, %v538_v39  ;;  %v543_v47 = vsel %vm2424_vm2, %v2018_v25, 0  ;;  %v761_v39 = vld [vmem:[%s2417_s2 + $0x8] sm:$0xff] }
  0xb8   : > { %672 = vrot.lane.b32.xlu1 %v418_v16, %s1908_s16  ;;  %vm541_vm0 = vcmp.ne.s16.totalorder %v2085_v42, 0 }
  0xb9   : > { %1738 = vrot.lane.b32.xlu0 %v1902_v1, %s1909_s23  ;;  %v2093_v44 = vpop.permute.xlu0 %585  ;;  %v544_v45 = vsel %vm541_vm0, %v2016_v24, 0 }
  0xba   : > { %v588_v43 = vpop.permute.xlu1 %587  ;;  %vm2423_vm4 = vcmp.ne.s16.totalorder %v2093_v44, 0 }
  0xbb   : > { %v2103_v46 = vsel %vm456_vm1, %v2093_v44, %v588_v43  ;;  %v593_v49 = vsel %vm2423_vm4, %v2018_v25, 0  ;;  %vm394_vm4 = vcmask 130048  }
  0xbc   : > { %1743 = vrot.lane.b32.xlu1 %v1902_v1, %s1909_s23  ;;  %vm2425_vm3 = vcmp.ne.s16.totalorder %v2103_v46, 0 }
  0xbd   : > { %674 = vrot.lane.b32.xlu0 %v422_v18, %s1908_s16  ;;  %v594_v48 = vsel %vm2425_vm3, %v2016_v24, 0  ;;  %v1729_v52 = vpop.permute.xlu0 %1728 }
  0xbe   : > { %v1734_v51 = vpop.permute.xlu1 %1733  ;;  %v1731_v54 = vunpack.i.h.bf16 %v1729_v52  ;;  %v1730_v55 = vunpack.i.l.bf16 %v1729_v52 }
  0xbf   : > { %v1735_v53 = vunpack.i.l.bf16 %v1734_v51  ;;  %v1736_v60 = vunpack.i.h.bf16 %v1734_v51 }
  0xc0   : > { %448 = vrot.lane.b32.xlu1 %v434_v33, %s1907_s15 }
  0xc1   : > { %446 = vrot.lane.b32.xlu0 %v433_v36, %s1907_s15  ;;  %v361_v62 = vsel %vm357_vm5, %v1731_v54, %v1735_v53  ;;  %v360_v0 = vsel %vm357_vm5, %v1736_v60, %v1731_v54 }
  0xc4   : > { %1753 = vrot.lane.b32.xlu1 %v1902_v1, %s1907_s15 }
  0xc5   : > { %1748 = vrot.lane.b32.xlu0 %v1902_v1, %s1907_s15 }
  0xc8   : > { %500 = vrot.lane.b32.xlu1 %v486_v38, %s1906_s14  ;;  %v760_v38 = vld [vmem:[%s2417_s2] sm:$0xff] }
  0xc9   : > { %498 = vrot.lane.b32.xlu0 %v485_v41, %s1906_s14 }
  0xcc   : > { %1763 = vrot.lane.b32.xlu1 %v1902_v1, %s1906_s14 }
  0xcd   : > { %1758 = vrot.lane.b32.xlu0 %v1902_v1, %s1906_s14 }
  0xd0   : > { %1768 = vrot.lane.b32.xlu1 %v1902_v1, %s1905_s13 }
  0xd1   : > { %557 = vrot.lane.b32.xlu0 %v544_v45, %s1905_s13  ;;  %v763_v45 = vld [vmem:[%s2417_s2 + $0x18] sm:$0xff] }
  0xd4   : > { %1773 = vrot.lane.b32.xlu1 %v1902_v1, %s1905_s13 }
  0xd5   : > { %555 = vrot.lane.b32.xlu0 %v543_v47, %s1905_s13 }
  0xd8   : > { %1778 = vrot.lane.b32.xlu1 %v1902_v1, %s1904_s12 }
  0xd9   : > { %607 = vrot.lane.b32.xlu0 %v594_v48, %s1904_s12  ;;  %v762_v48 = vld [vmem:[%s2417_s2 + $0x10] sm:$0xff] }
  0xdc   : > { %1783 = vrot.lane.b32.xlu1 %v1902_v1, %s1904_s12 }
  0xdd   : > { %605 = vrot.lane.b32.xlu0 %v593_v49, %s1904_s12 }
  0xe0   : > { %1788 = vrot.lane.b32.xlu1 %v1902_v1, %s1910_s24 }
  0xe1   : > { %643 = vrot.lane.b32.xlu0 %v2016_v24, %s1910_s24 }
  0xe4   : > { %1793 = vrot.lane.b32.xlu1 %v1902_v1, %s1910_s24 }
  0xe5   : > { %641 = vrot.lane.b32.xlu0 %v2018_v25, %s1910_s24 }
  0xe8   : > { %1798 = vrot.lane.b32.xlu1 %v1902_v1, %s1903_s11 }
  0xec   : > { %1803 = vrot.lane.b32.xlu1 %v1902_v1, %s1903_s11 }
  0xf0   : > { %771 = vperm.xlu1 %1808, %v761_v39  }
  0xf4   : > { %776 = vperm.xlu1 %1808, %v762_v48  }
  0xf8   : > { %1810 = vrot.lane.b32.xlu1 %v1902_v1, %s1908_s16 }
 0x122   : > { %v350_v56 = vpop.permute.xlu1 %349 }
 0x123   : > { %v348_v57 = vpop.permute.xlu0 %347 }
 0x124   : > { %v359_v58 = vsel %vm357_vm5, %v348_v57, %v350_v56  ;;  %v358_v59 = vsel %vm357_vm5, %v1730_v55, %v348_v57 }
 0x125   : > { %821 = vmatprep.subr.bf16.mxu0 %v359_v58 }
 0x126   : > { %v387_v61 = vpop.permute.xlu1 %386  ;;  %822 = vmatpush1.bf16.msra.mxu0 %v358_v59 }
 0x127   : > { %823 = vmatprep.subr.bf16.mxu0 %v361_v62  ;;  %v385_v63 = vpop.permute.xlu0 %384 }
 0x128   : > { %v396_v3 = vsel %vm394_vm4, %v385_v63, %v387_v61 }
 0x12a   : > { %v2142_v2 = vpop.permute.xlu1 %672  ;;  %824 = vmatpush1.bf16.msra.mxu0 %v360_v0 }
 0x12b   : > { %825 = vmatprep.subr.bf16.mxu0 %v396_v3  ;;  %v1739_v4 = vpop.permute.xlu0 %1738  ;;  %vm677_vm3 = vcmp.ne.s16.totalorder %v2142_v2, 0 }
 0x12c   : > { %v1740_v6 = vunpack.i.l.bf16 %v1739_v4  ;;  %v1741_v9 = vunpack.i.h.bf16 %v1739_v4  ;;  %v680_v20 = vsel %vm677_vm3, %v2018_v25, 0 }
 0x12e   : > { %v1744_v7 = vpop.permute.xlu1 %1743  ;;  %v395_v8 = vsel %vm394_vm4, %v1740_v6, %v385_v63 }
 0x12f   : > { %v1746_v10 = vunpack.i.h.bf16 %v1744_v7  ;;  %v1745_v11 = vunpack.i.l.bf16 %v1744_v7  ;;  %v675_v12 = vpop.permute.xlu0 %674  ;;  %826 = vmatpush1.bf16.msra.mxu0 %v395_v8 }
 0x130   : > { %v2148_v13 = vsel %vm357_vm5, %v2142_v2, %v675_v12  ;;  %v1651_v2 = vld [vmem:[%s2417_s2 + $0x38] sm:$0xff] }
 0x131   : > { %vm678_vm2 = vcmp.ne.s16.totalorder %v2148_v13, 0  ;;  %v398_v14 = vsel %vm394_vm4, %v1741_v9, %v1745_v11  ;;  %v397_v15 = vsel %vm394_vm4, %v1746_v10, %v1741_v9  ;;  %v1649_v13 = vld [vmem:[%s2417_s2 + $0x28] sm:$0xff] }
 0x132   : > { %827 = vmatprep.subr.bf16.mxu0 %v398_v14  ;;  %v681_v16 = vsel %vm678_vm2, %v2016_v24, 0  ;;  %v449_v17 = vpop.permute.xlu1 %448 }
 0x133   : > { %694 = vrot.lane.b32.xlu0 %v681_v16, %s1903_s11  ;;  %828 = vmatpush1.bf16.msra.mxu0 %v397_v15  ;;  %v447_v18 = vpop.permute.xlu0 %446 }
 0x134   : > { %v458_v19 = vsel %vm456_vm1, %v447_v18, %v449_v17 }
 0x135   : > { %829 = vmatprep.subr.bf16.mxu0 %v458_v19 }
 0x136   : > { %v1754_v21 = vpop.permute.xlu1 %1753 }
 0x137   : > { %692 = vrot.lane.b32.xlu0 %v680_v20, %s1903_s11  ;;  %v1749_v22 = vpop.permute.xlu0 %1748  ;;  %v1755_v23 = vunpack.i.l.bf16 %v1754_v21  ;;  %v1756_v30 = vunpack.i.h.bf16 %v1754_v21 }
 0x138   : > { %v1751_v28 = vunpack.i.h.bf16 %v1749_v22  ;;  %v1750_v29 = vunpack.i.l.bf16 %v1749_v22 }
 0x13a   : > { %v457_v33 = vsel %vm456_vm1, %v1750_v29, %v447_v18  ;;  %v460_v35 = vsel %vm456_vm1, %v1751_v28, %v1755_v23  ;;  %v501_v36 = vpop.permute.xlu1 %500  ;;  %v459_v43 = vsel %vm456_vm1, %v1756_v30, %v1751_v28 }
 0x13b   : > { %830 = vmatpush1.bf16.msra.mxu0 %v457_v33  ;;  %v499_v41 = vpop.permute.xlu0 %498  ;;  %766 = vperm.xlu0 %1807, %v760_v38  }
 0x13c   : > { %831 = vmatprep.subr.bf16.mxu0 %v460_v35  ;;  %v510_v47 = vsel %vm2426_vm15, %v499_v41, %v501_v36 }
 0x13e   : > { %v1764_v49 = vpop.permute.xlu1 %1763 }
 0x13f   : > { %v1759_v50 = vpop.permute.xlu0 %1758  ;;  %832 = vmatpush1.bf16.msra.mxu0 %v459_v43  ;;  %v1765_v51 = vunpack.i.l.bf16 %v1764_v49  ;;  %781 = vperm.xlu0 %1807, %v763_v45   ;;  %v1766_v54 = vunpack.i.h.bf16 %v1764_v49  ;;  %v1842_v43 = vld [vmem:[#allocation5 + $0x1c] ss:$12 sps:$4 sm:$0xff]   ;;  %v1844_v45 = vld [vmem:[#allocation5 + $0x18] ss:$12 sps:$4 sm:$0xff]  }
 0x140   : > { %v1761_v52 = vunpack.i.h.bf16 %v1759_v50  ;;  %v1760_v53 = vunpack.i.l.bf16 %v1759_v50  ;;  %833 = vmatprep.subr.bf16.mxu0 %v510_v47 }
 0x142   : > { %v509_v55 = vsel %vm2426_vm15, %v1760_v53, %v499_v41  ;;  %v512_v56 = vsel %vm2426_vm15, %v1761_v52, %v1765_v51  ;;  %v1769_v57 = vpop.permute.xlu1 %1768  ;;  %v511_v59 = vsel %vm2426_vm15, %v1766_v54, %v1761_v52  ;;  %vm2427_vm15 = vcmask 916480   ;;  %v1839_v41 = vld [vmem:[#allocation5] ss:$12 sps:$4 sm:$0xff]  }
 0x143   : > { %834 = vmatpush1.bf16.msra.mxu0 %v509_v55  ;;  %v558_v58 = vpop.permute.xlu0 %557  ;;  %v1770_v62 = vunpack.i.l.bf16 %v1769_v57  ;;  %v1771_v3 = vunpack.i.h.bf16 %v1769_v57  ;;  %1815 = vrot.lane.b32.xlu0 %v1902_v1, %s1909_s23 }
 0x144   : > { %835 = vmatprep.subr.bf16.mxu0 %v512_v56 }
 0x145   : > { %v568_v6 = vsel %vm479_vm12, %v558_v58, %v1770_v62 }
 0x146   : > { %v1774_v60 = vpop.permute.xlu1 %1773 }
 0x147   : > { %836 = vmatpush1.bf16.msra.mxu0 %v511_v59  ;;  %v556_v61 = vpop.permute.xlu0 %555  ;;  %v1775_v4 = vunpack.i.l.bf16 %v1774_v60  ;;  %v1776_v8 = vunpack.i.h.bf16 %v1774_v60  ;;  %v1845_v59 = vld [vmem:[#allocation5 + $0x8] ss:$12 sps:$4 sm:$0xff]   ;;  %v1846_v60 = vld [vmem:[#allocation5 + $0x20] ss:$12 sps:$4 sm:$0xff]  }
 0x148   : > { %837 = vmatprep.subr.bf16.mxu0 %v2016_v24  ;;  %v567_v9 = vsel %vm479_vm12, %v556_v61, %v558_v58 }
 0x149   : > { %v570_v24 = vsel %vm479_vm12, %v1771_v3, %v1775_v4 }
 0x14a   : > { %v1779_v63 = vpop.permute.xlu1 %1778 }
 0x14b   : > { %838 = vmatpush1.bf16.msra.mxu0 %v2018_v25  ;;  %v608_v0 = vpop.permute.xlu0 %607  ;;  %v1780_v10 = vunpack.i.l.bf16 %v1779_v63  ;;  %v569_v25 = vsel %vm479_vm12, %v1776_v8, %v1771_v3  ;;  %v1781_v14 = vunpack.i.h.bf16 %v1779_v63 }
 0x14c   : > { %839 = vmatprep.subr.bf16.mxu0 %v1902_v1 }
 0x14d   : > { %v618_v16 = vsel %vm427_vm9, %v608_v0, %v1780_v10 }
 0x14e   : > { %v1784_v7 = vpop.permute.xlu1 %1783 }
 0x14f   : > { %840 = vmatpush1.bf16.msra.mxu0 %v1902_v1  ;;  %v606_v11 = vpop.permute.xlu0 %605  ;;  %v1785_v15 = vunpack.i.l.bf16 %v1784_v7  ;;  %v1786_v18 = vunpack.i.h.bf16 %v1784_v7 }
 0x150   : > { %841 = vmatprep.subr.bf16.mxu0 %v568_v6  ;;  %v617_v19 = vsel %vm427_vm9, %v606_v11, %v608_v0 }
 0x151   : > { %v620_v21 = vsel %vm427_vm9, %v1781_v14, %v1785_v15  ;;  %v619_v23 = vsel %vm427_vm9, %v1786_v18, %v1781_v14 }
 0x152   : > { %v1789_v12 = vpop.permute.xlu1 %1788 }
 0x153   : > { %842 = vmatpush1.bf16.msra.mxu0 %v567_v9  ;;  %v644_v17 = vpop.permute.xlu0 %643  ;;  %v1790_v20 = vunpack.i.l.bf16 %v1789_v12  ;;  %v1791_v28 = vunpack.i.h.bf16 %v1789_v12 }
 0x154   : > { %843 = vmatprep.subr.bf16.mxu0 %v570_v24 }
 0x155   : > { %v655_v33 = vsel %vm2427_vm15, %v644_v17, %v1790_v20 }
 0x156   : > { %v1794_v22 = vpop.permute.xlu1 %1793 }
 0x157   : > { %844 = vmatpush1.bf16.msra.mxu0 %v569_v25  ;;  %v642_v29 = vpop.permute.xlu0 %641  ;;  %v1795_v30 = vunpack.i.l.bf16 %v1794_v22  ;;  %v1796_v35 = vunpack.i.h.bf16 %v1794_v22 }
 0x158   : > { %845 = vmatprep.subr.bf16.mxu0 %v618_v16  ;;  %v654_v36 = vsel %vm2427_vm15, %v642_v29, %v644_v17 }
 0x159   : > { %v657_v38 = vsel %vm2427_vm15, %v1791_v28, %v1795_v30  ;;  %v656_v39 = vsel %vm2427_vm15, %v1796_v35, %v1791_v28  ;;  %vm814_vm15 = vcmask 261120  }
 0x15a   : > { %v1799_v47 = vpop.permute.xlu1 %1798 }
 0x15b   : > { %846 = vmatpush1.bf16.msra.mxu0 %v617_v19  ;;  %v1800_v48 = vunpack.i.l.bf16 %v1799_v47  ;;  %v1801_v52 = vunpack.i.h.bf16 %v1799_v47 }
 0x15c   : > { %847 = vmatprep.subr.bf16.mxu0 %v620_v21 }
 0x15e   : > { %v1804_v49 = vpop.permute.xlu1 %1803 }
 0x15f   : > { %848 = vmatpush1.bf16.msra.mxu0 %v619_v23  ;;  %v1805_v53 = vunpack.i.l.bf16 %v1804_v49  ;;  %v1806_v55 = vunpack.i.h.bf16 %v1804_v49 }
 0x160   : > { %849 = vmatprep.subr.bf16.mxu0 %v655_v33 }
 0x161   : > { %v707_v57 = vsel %vm328_vm6, %v1801_v52, %v1805_v53  ;;  %v706_v58 = vsel %vm328_vm6, %v1806_v55, %v1801_v52 }
 0x163   : > { %850 = vmatpush1.bf16.msra.mxu0 %v654_v36 }
 0x164   : > { %851 = vmatprep.subr.bf16.mxu0 %v657_v38 }
 0x167   : > { %852 = vmatpush1.bf16.msra.mxu0 %v656_v39 }
 0x16a   : > { %854 = vmatmul.mubr.bf16.vlgmr.msra.gmra.mrb[0].mxu0 %v1839_v41 }
 0x16b   : > { %863 = vmatprep.mubr.bf16.mxu0 %v1842_v43 }
 0x16f   : > { %v772_v4 = vpop.permute.xlu1 %771 }
 0x172   : > { %864 = vmatmul.mubr.bf16.gmra.mrb[4].mxu0 %v1844_v45 }
 0x173   : > { %906 = vmatprep.mubr.bf16.mxu0 %v1902_v1  ;;  %v777_v15 = vpop.permute.xlu1 %776 }
 0x1a5   : > { %v695_v50 = vpop.permute.xlu0 %694 }
 0x1a6   : > { %v705_v51 = vsel %vm328_vm6, %v695_v50, %v1800_v48 }
 0x1a7   : > { %874 = vmatprep.subr.bf16.mxu0 %v705_v51 }
 0x1a9   : > { %v693_v54 = vpop.permute.xlu0 %692 }
 0x1aa   : > { %v704_v56 = vsel %vm328_vm6, %v693_v54, %v695_v50 }
 0x1ab   : > { %875 = vmatpush1.bf16.msra.mxu0 %v704_v56 }
 0x1ac   : > { %876 = vmatprep.subr.bf16.mxu0 %v707_v57 }
 0x1af   : > { %877 = vmatpush1.bf16.msra.mxu0 %v706_v58  ;;  %v1648_v58 = vld [vmem:[%s2417_s2 + $0x20] sm:$0xff] }
 0x1b2   : > { %1646 = vmatmul.mubr.msk.bf16.vlgmr.msra.gmra.mrb[0].mxu0 %vm814_vm15, %v1845_v59  ;;  %v1650_v59 = vld [vmem:[%s2417_s2 + $0x30] sm:$0xff] }
 0x1b3   : > { %916 = vmatprep.mubr.bf16.mxu0 %v1902_v1 }
 0x1ba   : > { %1647 = vmatmul.mubr.msk.bf16.gmra.mrb[4].mxu0 %vm814_vm15, %v1846_v60  ;;  %v767_v61 = vpop.permute.xlu0 %766  ;;  %v307_v60 = vld [vmem:[%s2419_s4] sm:$0x1f] }
 0x1bb   : > { %1539 = vmatprep.mubr.bf16.mxu0 %v1902_v1 }
 0x1be   : > { %v782_v20 = vpop.permute.xlu0 %781 }
 0x285   : > { %v908_v62 = vpop.f32.mrb[0].mxu0 }
 0x286   : > { %v1665_v63 = vadd.f32 %v908_v62, %v767_v61  ;;  %v910_v0 = vpop.f32.mrb[1].mxu0  ;;  %v1811_v62 = vpop.permute.xlu1 %1810 }
 0x287   : > { %v1666_v3 = vadd.f32 %v910_v0, %v767_v61  ;;  %v912_v6 = vpop.f32.mrb[2].mxu0  ;;  %v1816_v61 = vpop.permute.xlu0 %1815 }
 0x288   : > { %v1667_v7 = vadd.f32 %v912_v6, %v772_v4  ;;  %v914_v8 = vpop.f32.mrb[3].mxu0  ;;  %v927_v10 = vmax.f32 %v1665_v63, 0.0 }
 0x289   : > { %v1668_v9 = vadd.f32 %v914_v8, %v772_v4  ;;  %v928_v11 = vmax.f32 %v1666_v3, 0.0  ;;  %v1812_v3 = vunpack.i.l.bf16 %v1811_v62 }
 0x28a   : > { %v929_v24 = vmax.f32 %v1667_v7, 0.0 }
 0x28b   : > { %v930_v25 = vmax.f32 %v1668_v9, 0.0 }
 0x28c   : > { %v2211_v12 = vpack.c.bf16 %v929_v24, %v927_v10  ;;  %v1813_v10 = vunpack.i.h.bf16 %v1811_v62 }
 0x28d   : > { %v2213_v14 = vpack.c.bf16 %v930_v25, %v928_v11  ;;  %v918_v16 = vpop.f32.mrb[4].mxu0  ;;  %v1817_v25 = vunpack.i.l.bf16 %v1816_v61 }
 0x28e   : > { %v1669_v17 = vadd.f32 %v918_v16, %v777_v15  ;;  %v920_v18 = vpop.f32.mrb[5].mxu0  ;;  %999 = vrot.lane.b32.xlu0 %v2211_v12, %s1909_s23  ;;  %v950_v19 = vsel %vm331_vm8, %v2211_v12, 0  ;;  %v1028_v27 = vsel %vm430_vm11, %v2211_v12, 0  ;;  %v1070_v48 = vsel %vm482_vm14, %v2211_v12, 0 }
 0x28f   : > { %v1670_v21 = vadd.f32 %v920_v18, %v777_v15  ;;  %v922_v22 = vpop.f32.mrb[6].mxu0  ;;  %963 = vrot.lane.b32.xlu1 %v950_v19, %s1908_s16  ;;  %v951_v30 = vsel %vm332_vm7, %v2213_v14, 0  ;;  %v1029_v47 = vsel %vm431_vm10, %v2213_v14, 0  ;;  %v1071_v32 = vsel %vm483_vm13, %v2213_v14, 0 }
 0x290   : > { %v1671_v23 = vadd.f32 %v922_v22, %v782_v20  ;;  %v924_v28 = vpop.f32.mrb[7].mxu0  ;;  %v931_v33 = vmax.f32 %v1669_v17, 0.0  ;;  %v1120_v51 = vsel %vm541_vm0, %v2213_v14, 0  ;;  %v1239_v56 = vsel %vm677_vm3, %v2211_v12, 0 }
 0x291   : > { %v1672_v29 = vadd.f32 %v924_v28, %v782_v20  ;;  %v932_v36 = vmax.f32 %v1670_v21, 0.0  ;;  %v1818_v22 = vunpack.i.h.bf16 %v1816_v61 }
 0x292   : > { %v933_v35 = vmax.f32 %v1671_v23, 0.0  ;;  %965 = vrot.lane.b32.xlu0 %v951_v30, %s1908_s16 }
 0x293   : > { %v934_v38 = vmax.f32 %v1672_v29, 0.0  ;;  %1001 = vrot.lane.b32.xlu1 %v2213_v14, %s1909_s23 }
 0x294   : > { %v2227_v39 = vpack.c.bf16 %v933_v35, %v931_v33 }
 0x295   : > { %v2229_v41 = vpack.c.bf16 %v934_v38, %v932_v36 }
 0x296   : > { %v953_v43 = vsel %vm331_vm8, %v2227_v39, 0  ;;  %v1031_v26 = vsel %vm430_vm11, %v2227_v39, 0  ;;  %v1073_v31 = vsel %vm482_vm14, %v2227_v39, 0  ;;  %vm2434_vm8 = vcmp.ne.s16.totalorder %v2077_v40, 0  ;;  %v1849_v40 = vld [vmem:[#allocation5 + $0x34] ss:$12 sps:$4 sm:$0xff]  }
 0x297   : > { %969 = vrot.lane.b32.xlu0 %v953_v43, %s1908_s16  ;;  %v954_v45 = vsel %vm332_vm7, %v2229_v41, 0  ;;  %v1032_v49 = vsel %vm431_vm10, %v2229_v41, 0  ;;  %v1074_v50 = vsel %vm483_vm13, %v2229_v41, 0  ;;  %vm2433_vm7 = vcmp.ne.s16.totalorder %v2103_v46, 0  ;;  %vm2435_vm10 = vmmov %vm2434_vm8  ;;  %1413 = vmatprep.mubr.bf16.mxu1 %v1849_v40 }
 0x298   : > { %971 = vrot.lane.b32.xlu1 %v954_v45, %s1908_s16  ;;  %v1162_v34 = vsel %vm2433_vm7, %v2213_v14, 0  ;;  %v1119_v37 = vsel %vm2434_vm8, %v2211_v12, 0  ;;  %v1123_v52 = vsel %vm541_vm0, %v2229_v41, 0  ;;  %v1122_v53 = vsel %vm2435_vm10, %v2227_v39, 0  ;;  %vm2438_vm14 = vmmov %vm2433_vm7 }
 0x299   : > { %vm2436_vm11 = vcmp.ne.s16.totalorder %v2093_v44, 0  ;;  %v1165_v55 = vsel %vm2438_vm14, %v2229_v41, 0  ;;  %v1240_v44 = vsel %vm678_vm2, %v2213_v14, 0  ;;  %v1243_v46 = vsel %vm678_vm2, %v2229_v41, 0 }
 0x29a   : > { %v1161_v54 = vsel %vm2436_vm11, %v2211_v12, 0  ;;  %vm2437_vm13 = vmmov %vm2436_vm11  ;;  %v1242_v57 = vsel %vm677_vm3, %v2227_v39, 0  ;;  %vm2439_vm0 = vcmask 7168  }
 0x29b   : > { %1007 = vrot.lane.b32.xlu0 %v2229_v41, %s1909_s23  ;;  %v1164_v42 = vsel %vm2437_vm13, %v2227_v39, 0  ;;  %vm2440_vm2 = vmmov %vm2439_vm0 }
 0x29c   : > { %1005 = vrot.lane.b32.xlu1 %v2227_v39, %s1909_s23  ;;  %vm2441_vm3 = vmmov %vm2439_vm0 }
 0x29f   : > { %1043 = vrot.lane.b32.xlu0 %v1029_v47, %s1907_s15 }
 0x2a0   : > { %1041 = vrot.lane.b32.xlu1 %v1028_v27, %s1907_s15 }
 0x2a3   : > { %1047 = vrot.lane.b32.xlu0 %v1031_v26, %s1907_s15 }
 0x2a4   : > { %1820 = vrot.lane.b32.xlu1 %v1902_v1, %s1907_s15 }
 0x2a7   : > { %1083 = vrot.lane.b32.xlu0 %v1070_v48, %s1906_s14 }
 0x2a8   : > { %1049 = vrot.lane.b32.xlu1 %v1032_v49, %s1907_s15 }
 0x2ab   : > { %1825 = vrot.lane.b32.xlu0 %v1902_v1, %s1906_s14 }
 0x2ac   : > { %1085 = vrot.lane.b32.xlu1 %v1071_v32, %s1906_s14 }
 0x2af   : > { %1091 = vrot.lane.b32.xlu0 %v1074_v50, %s1906_s14 }
 0x2b0   : > { %1089 = vrot.lane.b32.xlu1 %v1073_v31, %s1906_s14 }
 0x2b3   : > { %1830 = vrot.lane.b32.xlu0 %v1902_v1, %s1905_s13 }
 0x2b4   : > { %1133 = vrot.lane.b32.xlu1 %v1120_v51, %s1905_s13 }
 0x2b7   : > { %1175 = vrot.lane.b32.xlu0 %v1162_v34, %s1904_s12 }
 0x2b8   : > { %1131 = vrot.lane.b32.xlu1 %v1119_v37, %s1905_s13 }
 0x2bb   : > { %1139 = vrot.lane.b32.xlu0 %v1123_v52, %s1905_s13 }
 0x2bc   : > { %1137 = vrot.lane.b32.xlu1 %v1122_v53, %s1905_s13 }
 0x2bf   : > { %1173 = vrot.lane.b32.xlu0 %v1161_v54, %s1904_s12 }
 0x2c0   : > { %1835 = vrot.lane.b32.xlu1 %v1902_v1, %s1904_s12 }
 0x2c3   : > { %1179 = vrot.lane.b32.xlu0 %v1164_v42, %s1904_s12 }
 0x2c4   : > { %1211 = vrot.lane.b32.xlu1 %v2213_v14, %s1910_s24 }
 0x2c7   : > { %1213 = vrot.lane.b32.xlu0 %v1902_v1, %s1910_s24 }
 0x2c8   : > { %1181 = vrot.lane.b32.xlu1 %v1165_v55, %s1904_s12 }
 0x2cb   : > { %1217 = vrot.lane.b32.xlu0 %v2229_v41, %s1910_s24 }
 0x2cc   : > { %1209 = vrot.lane.b32.xlu1 %v2211_v12, %s1910_s24 }
 0x2cf   : > { %1215 = vrot.lane.b32.xlu0 %v2227_v39, %s1910_s24 }
 0x2d0   : > { %1219 = vrot.lane.b32.xlu1 %v1902_v1, %s1910_s24 }
 0x2d3   : > { %1255 = vrot.lane.b32.xlu0 %v1902_v1, %s1903_s11 }
 0x2d4   : > { %1253 = vrot.lane.b32.xlu1 %v1240_v44, %s1903_s11 }
 0x2d7   : > { %1259 = vrot.lane.b32.xlu0 %v1243_v46, %s1903_s11 }
 0x2d8   : > { %1251 = vrot.lane.b32.xlu1 %v1239_v56, %s1903_s11 }
 0x2db   : > { %1257 = vrot.lane.b32.xlu0 %v1242_v57, %s1903_s11 }
 0x2dc   : > { %1261 = vrot.lane.b32.xlu1 %v1902_v1, %s1903_s11 }
 0x2df   : > { %1332 = vperm.xlu0 %1807, %v1649_v13  }
 0x2e0   : > { %1327 = vperm.xlu1 %1808, %v1648_v58  }
 0x2e3   : > { %1342 = vperm.xlu0 %1807, %v1651_v2  }
 0x2e4   : > { %1337 = vperm.xlu1 %1808, %v1650_v59  }
 0x2e8   : > { %1501 = vperm.xlu1 %1808, %v307_v60  }
 0x300   : > { %v1000_v63 = vpop.permute.xlu0 %999 }
 0x301   : > { %v964_v0 = vpop.permute.xlu1 %963  ;;  %v1009_v19 = vsel %vm394_vm4, %v1817_v25, %v1000_v63 }
 0x302   : > { %v973_v8 = vsel %vm357_vm5, %v1812_v3, %v964_v0 }
 0x304   : > { %v966_v4 = vpop.permute.xlu0 %965 }
 0x305   : > { %v1002_v6 = vpop.permute.xlu1 %1001  ;;  %v974_v7 = vsel %vm357_vm5, %v964_v0, %v966_v4 }
 0x306   : > { %1381 = vmatprep.subr.bf16.mxu1 %v974_v7  ;;  %v1010_v17 = vsel %vm394_vm4, %v1000_v63, %v1002_v6 }
 0x307   : > { %1382 = vmatpush1.bf16.msra.mxu1 %v973_v8 }
 0x309   : > { %v970_v9 = vpop.permute.xlu0 %969 }
 0x30a   : > { %v972_v24 = vpop.permute.xlu1 %971  ;;  %v975_v15 = vsel %vm357_vm5, %v1813_v10, %v970_v9 }
 0x30b   : > { %v976_v11 = vsel %vm357_vm5, %v970_v9, %v972_v24 }
 0x30c   : > { %1383 = vmatprep.subr.bf16.mxu1 %v976_v11 }
 0x30d   : > { %v1008_v16 = vpop.permute.xlu0 %1007  ;;  %1384 = vmatpush1.bf16.msra.mxu1 %v975_v15 }
 0x30e   : > { %1385 = vmatprep.subr.bf16.mxu1 %v1010_v17  ;;  %v1006_v18 = vpop.permute.xlu1 %1005 }
 0x30f   : > { %v1012_v21 = vsel %vm394_vm4, %v1006_v18, %v1008_v16  ;;  %v1011_v28 = vsel %vm394_vm4, %v1818_v22, %v1006_v18  ;;  %vm2442_vm4 = vmmov %vm2439_vm0  ;;  %v1847_v16 = vld [vmem:[#allocation5 + $0x30] ss:$12 sps:$4 sm:$0xff]   ;;  %v1850_v18 = vld [vmem:[#allocation5 + $0x4c] ss:$12 sps:$4 sm:$0xff]  }
 0x311   : > { %v1044_v20 = vpop.permute.xlu0 %1043  ;;  %1386 = vmatpush1.bf16.msra.mxu1 %v1009_v19 }
 0x312   : > { %1387 = vmatprep.subr.bf16.mxu1 %v1012_v21  ;;  %v1042_v23 = vpop.permute.xlu1 %1041 }
 0x313   : > { %v1052_v30 = vsel %vm456_vm1, %v1042_v23, %v1044_v20 }
 0x315   : > { %v1048_v29 = vpop.permute.xlu0 %1047  ;;  %1388 = vmatpush1.bf16.msra.mxu1 %v1011_v28 }
 0x316   : > { %1389 = vmatprep.subr.bf16.mxu1 %v1052_v30  ;;  %v1821_v33 = vpop.permute.xlu1 %1820 }
 0x317   : > { %v1822_v35 = vunpack.i.l.bf16 %v1821_v33  ;;  %v1823_v36 = vunpack.i.h.bf16 %v1821_v33 }
 0x319   : > { %v1084_v38 = vpop.permute.xlu0 %1083  ;;  %v1051_v43 = vsel %vm456_vm1, %v1822_v35, %v1042_v23  ;;  %v1053_v26 = vsel %vm456_vm1, %v1823_v36, %v1048_v29  ;;  %v1852_v23 = vld [vmem:[#allocation5 + $0x48] ss:$12 sps:$4 sm:$0xff]   ;;  %v1853_v35 = vld [vmem:[#allocation5 + $0x38] ss:$12 sps:$4 sm:$0xff]   ;;  %v1854_v36 = vld [vmem:[#allocation5 + $0x50] ss:$12 sps:$4 sm:$0xff]  }
 0x31a   : > { %v1050_v45 = vpop.permute.xlu1 %1049  ;;  %1390 = vmatpush1.bf16.msra.mxu1 %v1051_v43 }
 0x31b   : > { %v1054_v47 = vsel %vm456_vm1, %v1048_v29, %v1050_v45 }
 0x31c   : > { %1391 = vmatprep.subr.bf16.mxu1 %v1054_v47 }
 0x31d   : > { %v1826_v27 = vpop.permute.xlu0 %1825 }
 0x31e   : > { %v1827_v48 = vunpack.i.l.bf16 %v1826_v27  ;;  %v1086_v49 = vpop.permute.xlu1 %1085  ;;  %1392 = vmatpush1.bf16.msra.mxu1 %v1053_v26  ;;  %v1828_v34 = vunpack.i.h.bf16 %v1826_v27 }
 0x31f   : > { %v1094_v32 = vsel %vm2439_vm0, %v1084_v38, %v1086_v49 }
 0x320   : > { %1393 = vmatprep.subr.bf16.mxu1 %v1094_v32  ;;  %v1093_v50 = vsel %vm2440_vm2, %v1827_v48, %v1084_v38 }
 0x321   : > { %v1092_v31 = vpop.permute.xlu0 %1091 }
 0x322   : > { %v1090_v51 = vpop.permute.xlu1 %1089  ;;  %1394 = vmatpush1.bf16.msra.mxu1 %v1093_v50 }
 0x323   : > { %v1096_v37 = vsel %vm2441_vm3, %v1090_v51, %v1092_v31  ;;  %v1095_v53 = vsel %vm2442_vm4, %v1828_v34, %v1090_v51 }
 0x324   : > { %1395 = vmatprep.subr.bf16.mxu1 %v1096_v37 }
 0x325   : > { %v1831_v52 = vpop.permute.xlu0 %1830 }
 0x326   : > { %v1134_v54 = vpop.permute.xlu1 %1133  ;;  %1396 = vmatpush1.bf16.msra.mxu1 %v1095_v53  ;;  %v1832_v40 = vunpack.i.l.bf16 %v1831_v52  ;;  %v1833_v57 = vunpack.i.h.bf16 %v1831_v52 }
 0x327   : > { %1397 = vmatprep.subr.bf16.mxu1 %v2213_v14 }
 0x328   : > { %v1144_v56 = vsel %vm479_vm12, %v1134_v54, %v1832_v40 }
 0x329   : > { %v1176_v42 = vpop.permute.xlu0 %1175 }
 0x32a   : > { %v1132_v55 = vpop.permute.xlu1 %1131  ;;  %1398 = vmatpush1.bf16.msra.mxu1 %v2211_v12 }
 0x32b   : > { %1399 = vmatprep.subr.bf16.mxu1 %v2229_v41  ;;  %v1143_v58 = vsel %vm479_vm12, %v1132_v55, %v1134_v54 }
 0x32d   : > { %v1140_v44 = vpop.permute.xlu0 %1139 }
 0x32e   : > { %v1138_v46 = vpop.permute.xlu1 %1137  ;;  %1400 = vmatpush1.bf16.msra.mxu1 %v2227_v39  ;;  %v1146_v14 = vsel %vm479_vm12, %v1140_v44, %v1833_v57 }
 0x32f   : > { %1401 = vmatprep.subr.bf16.mxu1 %v1144_v56  ;;  %v1145_v41 = vsel %vm479_vm12, %v1138_v46, %v1140_v44  ;;  %vm2443_vm12 = vcmask 916480  }
 0x330   : > { %vm2444_vm1 = vmmov %vm2443_vm12 }
 0x331   : > { %v1174_v13 = vpop.permute.xlu0 %1173  ;;  %vm2445_vm5 = vmmov %vm2444_vm1 }
 0x332   : > { %v1836_v2 = vpop.permute.xlu1 %1835  ;;  %1402 = vmatpush1.bf16.msra.mxu1 %v1143_v58  ;;  %v1185_v63 = vsel %vm427_vm9, %v1174_v13, %v1176_v42  ;;  %vm2446_vm7 = vmmov %vm2444_vm1 }
 0x333   : > { %v1837_v59 = vunpack.i.l.bf16 %v1836_v2  ;;  %1403 = vmatprep.subr.bf16.mxu1 %v1146_v14  ;;  %v1838_v39 = vunpack.i.h.bf16 %v1836_v2 }
 0x335   : > { %v1180_v12 = vpop.permute.xlu0 %1179  ;;  %v1186_v60 = vsel %vm427_vm9, %v1176_v42, %v1837_v59 }
 0x336   : > { %v1212_v61 = vpop.permute.xlu1 %1211  ;;  %1404 = vmatpush1.bf16.msra.mxu1 %v1145_v41 }
 0x337   : > { %1405 = vmatprep.subr.bf16.mxu1 %v1186_v60  ;;  %v306_v60 = vld [vmem:[%s2418_s3] sm:$0x7] }
 0x339   : > { %v1214_v62 = vpop.permute.xlu0 %1213 }
 0x33a   : > { %v1182_v0 = vpop.permute.xlu1 %1181  ;;  %1406 = vmatpush1.bf16.msra.mxu1 %v1185_v63  ;;  %v1222_v8 = vsel %vm2443_vm12, %v1212_v61, %v1214_v62 }
 0x33b   : > { %v1188_v3 = vsel %vm427_vm9, %v1182_v0, %v1838_v39  ;;  %v1187_v6 = vsel %vm427_vm9, %v1180_v12, %v1182_v0  ;;  %vm1548_vm9 = vcmp.lt.s32.totalorder %v1988_v5, 1 }
 0x33c   : > { %1407 = vmatprep.subr.bf16.mxu1 %v1188_v3 }
 0x33d   : > { %v1218_v4 = vpop.permute.xlu0 %1217 }
 0x33e   : > { %v1210_v7 = vpop.permute.xlu1 %1209  ;;  %1408 = vmatpush1.bf16.msra.mxu1 %v1187_v6 }
 0x33f   : > { %1409 = vmatprep.subr.bf16.mxu1 %v1222_v8  ;;  %v1221_v10 = vsel %vm2444_vm1, %v1210_v7, %v1212_v61 }
 0x341   : > { %v1216_v9 = vpop.permute.xlu0 %1215 }
 0x342   : > { %v1220_v24 = vpop.permute.xlu1 %1219  ;;  %1410 = vmatpush1.bf16.msra.mxu1 %v1221_v10  ;;  %v1223_v15 = vsel %vm2446_vm7, %v1216_v9, %v1218_v4 }
 0x343   : > { %v1224_v11 = vsel %vm2445_vm5, %v1218_v4, %v1220_v24 }
 0x344   : > { %1411 = vmatprep.subr.bf16.mxu1 %v1224_v11 }
 0x345   : > { %v1256_v25 = vpop.permute.xlu0 %1255 }
 0x346   : > { %v1254_v17 = vpop.permute.xlu1 %1253  ;;  %1412 = vmatpush1.bf16.msra.mxu1 %v1223_v15 }
 0x347   : > { %v1264_v19 = vsel %vm328_vm6, %v1254_v17, %v1256_v25 }
 0x348   : > { %1434 = vmatprep.subr.bf16.mxu1 %v1264_v19 }
 0x349   : > { %v1260_v20 = vpop.permute.xlu0 %1259  ;;  %1414 = vmatmul.mubr.bf16.vlgmr.msra.gmra.mrb[0].mxu1 %v1847_v16 }
 0x34a   : > { %v1252_v21 = vpop.permute.xlu1 %1251  ;;  %1423 = vmatprep.mubr.bf16.mxu1 %v1850_v18 }
 0x34b   : > { %v1263_v22 = vsel %vm328_vm6, %v1252_v21, %v1254_v17 }
 0x34c   : > { %1435 = vmatpush1.bf16.msra.mxu1 %v1263_v22 }
 0x34d   : > { %v1258_v28 = vpop.permute.xlu0 %1257 }
 0x34e   : > { %v1262_v29 = vpop.permute.xlu1 %1261  ;;  %v1265_v33 = vsel %vm328_vm6, %v1258_v28, %v1260_v20 }
 0x34f   : > { %v1266_v30 = vsel %vm328_vm6, %v1260_v20, %v1262_v29  ;;  %vm1549_vm6 = vcmp.lt.s32.totalorder %v1988_v5, 3 }
 0x350   : > { %1436 = vmatprep.subr.bf16.mxu1 %v1266_v30 }
 0x351   : > { %1424 = vmatmul.mubr.bf16.gmra.mrb[4].mxu1 %v1852_v23 }
 0x352   : > { %1437 = vmatpush1.bf16.msra.mxu1 %v1265_v33  ;;  %1466 = vmatprep.mubr.bf16.mxu1 %v1902_v1 }
 0x359   : > { %1658 = vmatmul.mubr.msk.bf16.vlgmr.msra.gmra.mrb[0].mxu1 %vm814_vm15, %v1853_v35 }
 0x35a   : > { %1476 = vmatprep.mubr.bf16.mxu1 %v1902_v1 }
 0x35e   : > { %v1333_v27 = vpop.permute.xlu0 %1332 }
 0x35f   : > { %v1328_v38 = vpop.permute.xlu1 %1327 }
 0x361   : > { %1659 = vmatmul.mubr.msk.bf16.gmra.mrb[4].mxu1 %vm814_vm15, %v1854_v36 }
 0x362   : > { %v1343_v55 = vpop.permute.xlu0 %1342 }
 0x363   : > { %v1338_v53 = vpop.permute.xlu1 %1337 }
 0x367   : > { %v1502_v61 = vpop.permute.xlu1 %1501 }
 0x42c   : > { %v1468_v43 = vpop.f32.mrb[0].mxu1 }
 0x42d   : > { %v1673_v45 = vadd.f32 %v1468_v43, %v1328_v38  ;;  %v1470_v47 = vpop.f32.mrb[1].mxu1 }
 0x42e   : > { %v1674_v26 = vadd.f32 %v1470_v47, %v1328_v38  ;;  %v1472_v48 = vpop.f32.mrb[2].mxu1 }
 0x42f   : > { %v1675_v49 = vadd.f32 %v1472_v48, %v1333_v27  ;;  %v1474_v32 = vpop.f32.mrb[3].mxu1  ;;  %v1487_v31 = vmax.f32 %v1673_v45, 0.0 }
 0x430   : > { %v1676_v50 = vadd.f32 %v1474_v32, %v1333_v27  ;;  %v1488_v34 = vmax.f32 %v1674_v26, 0.0 }
 0x431   : > { %v1489_v51 = vmax.f32 %v1675_v49, 0.0 }
 0x432   : > { %v1490_v37 = vmax.f32 %v1676_v50, 0.0 }
 0x433   : > { %v1495_v52 = vpack.c.bf16 %v1489_v51, %v1487_v31 }
 0x434   : > { %v1496_v1 = vpack.c.bf16 %v1490_v37, %v1488_v34  ;;  %v1478_v54 = vpop.f32.mrb[4].mxu1 }
 0x435   : > { %v1677_v42 = vadd.f32 %v1478_v54, %v1338_v53  ;;  %v1480_v40 = vpop.f32.mrb[5].mxu1 }
 0x436   : > { %v1678_v44 = vadd.f32 %v1480_v40, %v1338_v53  ;;  %v1482_v46 = vpop.f32.mrb[6].mxu1  ;;  %1507 = vmatprep.subr.bf16.mxu0 %v1496_v1 }
 0x437   : > { %v1679_v56 = vadd.f32 %v1482_v46, %v1343_v55  ;;  %v1484_v57 = vpop.f32.mrb[7].mxu1  ;;  %1508 = vmatpush1.bf16.msra.mxu0 %v1495_v52  ;;  %v1491_v58 = vmax.f32 %v1677_v42, 0.0 }
 0x438   : > { %v1680_v13 = vadd.f32 %v1484_v57, %v1343_v55  ;;  %v1492_v14 = vmax.f32 %v1678_v44, 0.0 }
 0x439   : > { %v1493_v2 = vmax.f32 %v1679_v56, 0.0 }
 0x43a   : > { %v1494_v59 = vmax.f32 %v1680_v13, 0.0 }
 0x43b   : > { %v1497_v12 = vpack.c.bf16 %v1493_v2, %v1491_v58 }
 0x43c   : > { %v1498_v41 = vpack.c.bf16 %v1494_v59, %v1492_v14 }
 0x43e   : > { %1509 = vmatprep.subr.bf16.mxu0 %v1498_v41 }
 0x43f   : > { %1510 = vmatpush1.bf16.msra.mxu0 %v1497_v12 }
 0x442   : > { %1660 = vmatmul.mubr.msk.bf16.vlgmr.msra.gmra.mrb[8].mxu0 %vm814_vm15, %v306_v60 }
 0x515   : > { %v1541_v39 = vpop.f32.mrb[8].mxu0 }
 0x516   : > { %v1542_v62 = vadd.f32 %v1541_v39, %v1502_v61  ;;  %v1543_v63 = vpop.f32.mrb[9].mxu0 }
 0x517   : > { %v1544_v0 = vadd.f32 %v1543_v63, %v1502_v61  ;;  %v1545_v3 = vpop.f32.mrb[10].mxu0 }
 0x518   : > { %1855 = vtanh.f32 %v1542_v62  ;;  %v1546_v4 = vpop.f32.mrb[11].mxu0  ;;  %v1554_v9 = vmax.f32 %v1542_v62, 1e-05 }
 0x519   : > { %1857 = vtanh.f32 %v1544_v0  ;;  %v1555_v24 = vmax.f32 %v1544_v0, 1e-05 }
 0x522   : > { %v1856_v6 = vpop.eup %1855 }
 0x523   : > { %v1858_v7 = vpop.eup %1857  ;;  %v1552_v8 = vmul.f32 2.0, %v1856_v6 }
 0x524   : > { %v1553_v10 = vmul.f32 2.0, %v1858_v7 }
 0x525   : > { %v1556_v11 = vsel %vm1549_vm6, %v1552_v8, %v1554_v9 }
 0x526   : > { %v1558_v25 = vsel %vm1548_vm9, %v1542_v62, %v1556_v11  ;;  %v1557_v15 = vsel %vm1549_vm6, %v1553_v10, %v1555_v24 }
 0x527   : > { %1560 = vst [vmem:[%s239_s25] sm:$0x1f] %v1558_v25  ;;  %v1559_v16 = vsel %vm1548_vm9, %v1544_v0, %v1557_v15 }
 0x528   : > { %1561 = vst [vmem:[%s239_s25 + $0x8] sm:$0x1f] %v1559_v16 }
 0x529 PF: > { %s16_s18 = sadd.s32 1, %s1897_s18  }
 0x52a   : > { %p13_p3 = scmp.ge.s32.totalorder %s16_s18, 4  }
 0x52c   :  { %15 = sbr.rel (!%p13_p3) target bundleno = 1 (0x1), region = 77 }
 0x533   :  { %1583 = vsyncpa [#allocation6], 1 }
 0x534   :  { %1585 = vsyncpa [#allocation6 + $0x1], 1 }

</bundles_post_ra>
